<compile_context>
chip_gen: v7x
topology: tpu7x:2x2x1
jax: 0.10.0
libtpu: 0.0.40
codegen_flags: <defaults>
</compile_context>

<pallas_src>
import jax
import jax.numpy as jnp
from jax.experimental import pallas as pl
from jax.experimental.pallas import tpu as pltpu

GESTURE_VOCAB_SIZE = 16
HIDDEN_DIM = 512
LANG_DIM = 768
NUM_SURGEONS = 8
NUM_TIMESTEPS = 10
VISION_DIM = 1000

VISION_PAD = 1024      # pad contraction dim to a multiple of 128
OUT_PAD = 128          # lane-dense output width (>= GESTURE_VOCAB_SIZE)


def full_model_kernel(vis_ref, lang_ref, emb_ref, x_ref,
                      wv_ref, wl_ref, bf_ref,
                      w1_ref, b1_ref,
                      w2_ref, b2_ref,
                      out_ref):
    f32 = jnp.float32
    bf16 = jnp.bfloat16

    # --- VLAEncoder (fuse Linear folded into wv/wl at prep time) ---
    # cond = vis @ (Wv @ Wf_v) + lang @ (Wl @ Wf_l) + (bv@Wf_v + bl@Wf_l + bf) + emb
    cond = (jnp.dot(vis_ref[...], wv_ref[...], preferred_element_type=f32)
            + jnp.dot(lang_ref[...], wl_ref[...], preferred_element_type=f32)
            + bf_ref[...]
            + emb_ref[...])                              # (B, H) f32 (+ surgeon + time emb)

    # --- DiffusionGestureModel ---
    B = emb_ref.shape[0]
    BL, H = x_ref.shape
    L = BL // B
    cond_rows = jnp.broadcast_to(cond[:, None, :], (B, L, H)).reshape(BL, H)
    h = x_ref[...] + cond_rows                           # (B*L, H) f32

    h1 = jnp.maximum(
        jnp.dot(h.astype(bf16), w1_ref[...], preferred_element_type=f32) + b1_ref[...],
        0.0)
    out_ref[...] = (jnp.dot(h1.astype(bf16), w2_ref[...], preferred_element_type=f32)
                    + b2_ref[...])                       # (B*L, OUT_PAD) f32


def init_params(key):
    """f32 params matching the PyTorch module (weights stored as (in, out))."""
    ks = jax.random.split(key, 12)
    s = 0.02
    return {
        "wv": jax.random.normal(ks[0], (VISION_DIM, HIDDEN_DIM), jnp.float32) * s,
        "bv": jax.random.normal(ks[1], (1, HIDDEN_DIM), jnp.float32) * s,
        "wl": jax.random.normal(ks[2], (LANG_DIM, HIDDEN_DIM), jnp.float32) * s,
        "bl": jax.random.normal(ks[3], (1, HIDDEN_DIM), jnp.float32) * s,
        "wf": jax.random.normal(ks[4], (2 * HIDDEN_DIM, HIDDEN_DIM), jnp.float32) * s,
        "bf": jax.random.normal(ks[5], (1, HIDDEN_DIM), jnp.float32) * s,
        "surgeon_embed": jax.random.normal(ks[6], (NUM_SURGEONS, HIDDEN_DIM), jnp.float32) * s,
        "time_embed": jax.random.normal(ks[7], (NUM_TIMESTEPS, HIDDEN_DIM), jnp.float32) * s,
        "token_embed": jax.random.normal(ks[8], (GESTURE_VOCAB_SIZE, HIDDEN_DIM), jnp.float32) * s,
        "w1": jax.random.normal(ks[9], (HIDDEN_DIM, HIDDEN_DIM), jnp.float32) * s,
        "b1": jax.random.normal(ks[10], (1, HIDDEN_DIM), jnp.float32) * s,
        "w2": jax.random.normal(ks[11], (HIDDEN_DIM, GESTURE_VOCAB_SIZE), jnp.float32) * s,
        "b2": jnp.zeros((1, GESTURE_VOCAB_SIZE), jnp.float32),
    }


def prepare_kernel_params(params):
    """One-time prep: fold the fuse Linear into wv/wl (f32 math), pad wv (K) and w2/b2 (N),
    fold bv/bl into a single fused bias, then cast big weights to bf16."""
    bf16 = jnp.bfloat16
    wf_v = params["wf"][:HIDDEN_DIM]          # (H, H)
    wf_l = params["wf"][HIDDEN_DIM:]          # (H, H)
    wv_fold = params["wv"] @ wf_v             # (VISION_DIM, H)
    wl_fold = params["wl"] @ wf_l             # (LANG_DIM, H)
    b_fused = params["bv"] @ wf_v + params["bl"] @ wf_l + params["bf"]   # (1, H)

    wv_pad = jnp.pad(wv_fold, ((0, VISION_PAD - VISION_DIM), (0, 0)))
    w2_pad = jnp.pad(params["w2"], ((0, 0), (0, OUT_PAD - GESTURE_VOCAB_SIZE)))
    b2_pad = jnp.pad(params["b2"], ((0, 0), (0, OUT_PAD - GESTURE_VOCAB_SIZE)))
    return {
        "wv": wv_pad.astype(bf16),
        "wl": wl_fold.astype(bf16),
        "bf": b_fused,
        "w1": params["w1"].astype(bf16), "b1": params["b1"],
        "w2": w2_pad.astype(bf16), "b2": b2_pad,
        "surgeon_embed": params["surgeon_embed"],
        "time_embed": params["time_embed"],
        "token_embed": params["token_embed"],
    }


def full_model_forward(kparams, xt, vision_feat, lang_feat, surgeon_id, t):
    """xt: (B, L) int32; vision_feat: (B, VISION_DIM); lang_feat: (B, LANG_DIM);
    surgeon_id: (B,), t: (B,) int32  ->  (B, L, GESTURE_VOCAB_SIZE) f32."""
    B, L = xt.shape

    # Glue: embedding gathers + reshapes stay in plain JAX (cheap metadata / tiny gathers).
    x_emb = jnp.take(kparams["token_embed"], xt, axis=0).reshape(B * L, HIDDEN_DIM)  # (B*L, H)
    emb = (jnp.take(kparams["surgeon_embed"], surgeon_id, axis=0)
           + jnp.take(kparams["time_embed"], t, axis=0))                             # (B, H)
    vis = jnp.pad(vision_feat, ((0, 0), (0, VISION_PAD - VISION_DIM))).astype(jnp.bfloat16)
    lang = lang_feat.astype(jnp.bfloat16)

    operands = (vis, lang, emb, x_emb,
                kparams["wv"], kparams["wl"], kparams["bf"],
                kparams["w1"], kparams["b1"],
                kparams["w2"], kparams["b2"])

    flops = (2 * B * (VISION_PAD * HIDDEN_DIM + LANG_DIM * HIDDEN_DIM)
             + 2 * B * L * (HIDDEN_DIM * HIDDEN_DIM + HIDDEN_DIM * OUT_PAD))
    bytes_accessed = (sum(a.size * a.dtype.itemsize for a in operands)
                      + B * L * OUT_PAD * 4)

    vmem = pl.BlockSpec(memory_space=pltpu.MemorySpace.VMEM)
    out = pl.pallas_call(
        full_model_kernel,
        out_shape=jax.ShapeDtypeStruct((B * L, OUT_PAD), jnp.float32),
        in_specs=[vmem] * len(operands),
        out_specs=vmem,
        compiler_params=pltpu.CompilerParams(vmem_limit_bytes=16 << 20),
        cost_estimate=pl.CostEstimate(flops=flops, transcendentals=0,
                                      bytes_accessed=bytes_accessed),
    )(*operands)

    return out.reshape(B, L, OUT_PAD)[..., :GESTURE_VOCAB_SIZE]


def full_model_reference_f32(params, xt, vision_feat, lang_feat, surgeon_id, t):
    """Pure-f32 reference matching the original PyTorch FullModel semantics."""
    v = vision_feat @ params["wv"] + params["bv"]
    l = lang_feat @ params["wl"] + params["bl"]
    cond = jnp.concatenate([v, l], axis=-1) @ params["wf"] + params["bf"]
    cond = cond + jnp.take(params["surgeon_embed"], surgeon_id, axis=0)
    cond = cond + jnp.take(params["time_embed"], t, axis=0)
    x = jnp.take(params["token_embed"], xt, axis=0)
    h = x + cond[:, None, :]
    h = jnp.maximum(h @ params["w1"] + params["b1"], 0.0)
    return h @ params["w2"] + params["b2"]


def full_model_reference_quantized(kparams, xt, vision_feat, lang_feat, surgeon_id, t):
    """Plain-JAX reference using identical folding/bf16 quantization as the kernel."""
    bf16, f32 = jnp.bfloat16, jnp.float32
    B, L = xt.shape
    vis = jnp.pad(vision_feat, ((0, 0), (0, VISION_PAD - VISION_DIM))).astype(bf16)
    lang = lang_feat.astype(bf16)
    cond = (jnp.dot(vis, kparams["wv"], preferred_element_type=f32)
            + jnp.dot(lang, kparams["wl"], preferred_element_type=f32)
            + kparams["bf"]
            + jnp.take(kparams["surgeon_embed"], surgeon_id, axis=0)
            + jnp.take(kparams["time_embed"], t, axis=0))
    x = jnp.take(kparams["token_embed"], xt, axis=0)
    h = (x + cond[:, None, :]).reshape(B * L, HIDDEN_DIM)
    h1 = jnp.maximum(
        jnp.dot(h.astype(bf16), kparams["w1"], preferred_element_type=f32) + kparams["b1"], 0.0)
    logits = jnp.dot(h1.astype(bf16), kparams["w2"], preferred_element_type=f32) + kparams["b2"]
    return logits.reshape(B, L, OUT_PAD)[..., :GESTURE_VOCAB_SIZE]


if __name__ == "__main__":
    key = jax.random.PRNGKey(0)
    k_par, k_xt, k_vis, k_lang, k_sid, k_t = jax.random.split(key, 6)

    B, L = 2, 8
    params = init_params(k_par)
    kparams = prepare_kernel_params(params)

    xt = jax.random.randint(k_xt, (B, L), 0, GESTURE_VOCAB_SIZE, dtype=jnp.int32)
    vision_feat = jax.random.normal(k_vis, (B, VISION_DIM), jnp.float32)
    lang_feat = jax.random.normal(k_lang, (B, LANG_DIM), jnp.float32)
    surgeon_id = jax.random.randint(k_sid, (B,), 0, NUM_SURGEONS, dtype=jnp.int32)
    t = jax.random.randint(k_t, (B,), 0, NUM_TIMESTEPS, dtype=jnp.int32)

    out = full_model_forward(kparams, xt, vision_feat, lang_feat, surgeon_id, t)
    out = jax.block_until_ready(out)
    assert out.shape == (B, L, GESTURE_VOCAB_SIZE), out.shape

    # Exact-math check vs a plain-JAX reference with identical folding/bf16 quantization.
    ref_q = full_model_reference_quantized(kparams, xt, vision_feat, lang_feat, surgeon_id, t)
    assert jnp.allclose(out, ref_q, atol=2e-3, rtol=2e-3), "mismatch vs bf16-quantized reference"

    # Semantic check vs the original f32 module (loose tolerance for bf16 weights + fold).
    ref_f = full_model_reference_f32(params, xt, vision_feat, lang_feat, surgeon_id, t)
    assert jnp.allclose(out, ref_f, atol=5e-2, rtol=5e-2), "mismatch vs f32 reference"

    print("KERNEL_OK")
</pallas_src>

<mosaic_0001>
module attributes {stable_mosaic.version = 11 : i64} {
  func.func @full_model_kernel(%arg0: memref<2x1024xbf16, #tpu.memory_space<vmem>>, %arg1: memref<2x768xbf16, #tpu.memory_space<vmem>>, %arg2: memref<2x512xf32, #tpu.memory_space<vmem>>, %arg3: memref<16x512xf32, #tpu.memory_space<vmem>>, %arg4: memref<1024x512xbf16, #tpu.memory_space<vmem>>, %arg5: memref<768x512xbf16, #tpu.memory_space<vmem>>, %arg6: memref<1x512xf32, #tpu.memory_space<vmem>>, %arg7: memref<512x512xbf16, #tpu.memory_space<vmem>>, %arg8: memref<1x512xf32, #tpu.memory_space<vmem>>, %arg9: memref<512x128xbf16, #tpu.memory_space<vmem>>, %arg10: memref<1x128xf32, #tpu.memory_space<vmem>>, %arg11: memref<16x128xf32, #tpu.memory_space<vmem>>) attributes {dimension_semantics = [], scalar_prefetch = 0 : i64, scratch_operands = 0 : i64, tpu.core_type = #tpu.core_type<tc>} {
    %c0 = arith.constant 0 : index
    %c0_0 = arith.constant 0 : index
    %0 = vector.load %arg0[%c0, %c0_0] : memref<2x1024xbf16, #tpu.memory_space<vmem>>, vector<2x1024xbf16>
    %c0_1 = arith.constant 0 : index
    %c0_2 = arith.constant 0 : index
    %1 = vector.load %arg4[%c0_1, %c0_2] : memref<1024x512xbf16, #tpu.memory_space<vmem>>, vector<1024x512xbf16>
    %cst = arith.constant dense<0.000000e+00> : vector<2x512xf32>
    %2 = tpu.matmul %0, %1, %cst {dimension_numbers = #tpu.dot_dimension_numbers<[1], [0], [0], [1], [0, 0, 1, 1], [], []>} : vector<2x1024xbf16>, vector<1024x512xbf16>, vector<2x512xf32> -> vector<2x512xf32>
    %c0_3 = arith.constant 0 : index
    %c0_4 = arith.constant 0 : index
    %3 = vector.load %arg1[%c0_3, %c0_4] : memref<2x768xbf16, #tpu.memory_space<vmem>>, vector<2x768xbf16>
    %c0_5 = arith.constant 0 : index
    %c0_6 = arith.constant 0 : index
    %4 = vector.load %arg5[%c0_5, %c0_6] : memref<768x512xbf16, #tpu.memory_space<vmem>>, vector<768x512xbf16>
    %cst_7 = arith.constant dense<0.000000e+00> : vector<2x512xf32>
    %5 = tpu.matmul %3, %4, %cst_7 {dimension_numbers = #tpu.dot_dimension_numbers<[1], [0], [0], [1], [0, 0, 1, 1], [], []>} : vector<2x768xbf16>, vector<768x512xbf16>, vector<2x512xf32> -> vector<2x512xf32>
    %6 = arith.addf %2, %5 : vector<2x512xf32>
    %c0_8 = arith.constant 0 : index
    %c0_9 = arith.constant 0 : index
    %7 = vector.load %arg6[%c0_8, %c0_9] : memref<1x512xf32, #tpu.memory_space<vmem>>, vector<1x512xf32>
    %8 = vector.broadcast %7 : vector<1x512xf32> to vector<2x512xf32>
    %9 = arith.addf %6, %8 : vector<2x512xf32>
    %c0_10 = arith.constant 0 : index
    %c0_11 = arith.constant 0 : index
    %10 = vector.load %arg2[%c0_10, %c0_11] : memref<2x512xf32, #tpu.memory_space<vmem>>, vector<2x512xf32>
    %11 = arith.addf %9, %10 : vector<2x512xf32>
    %12 = vector.shape_cast %11 : vector<2x512xf32> to vector<2x1x512xf32>
    %13 = vector.shape_cast %12 : vector<2x1x512xf32> to vector<2x1x512xf32>
    %14 = vector.broadcast %13 : vector<2x1x512xf32> to vector<2x8x512xf32>
    %15 = vector.shape_cast %14 : vector<2x8x512xf32> to vector<16x512xf32>
    %c0_12 = arith.constant 0 : index
    %c0_13 = arith.constant 0 : index
    %16 = vector.load %arg3[%c0_12, %c0_13] : memref<16x512xf32, #tpu.memory_space<vmem>>, vector<16x512xf32>
    %17 = arith.addf %16, %15 : vector<16x512xf32>
    %18 = arith.truncf %17 : vector<16x512xf32> to vector<16x512xbf16>
    %c0_14 = arith.constant 0 : index
    %c0_15 = arith.constant 0 : index
    %19 = vector.load %arg7[%c0_14, %c0_15] : memref<512x512xbf16, #tpu.memory_space<vmem>>, vector<512x512xbf16>
    %cst_16 = arith.constant dense<0.000000e+00> : vector<16x512xf32>
    %20 = tpu.matmul %18, %19, %cst_16 {dimension_numbers = #tpu.dot_dimension_numbers<[1], [0], [0], [1], [0, 0, 1, 1], [], []>} : vector<16x512xbf16>, vector<512x512xbf16>, vector<16x512xf32> -> vector<16x512xf32>
    %c0_17 = arith.constant 0 : index
    %c0_18 = arith.constant 0 : index
    %21 = vector.load %arg8[%c0_17, %c0_18] : memref<1x512xf32, #tpu.memory_space<vmem>>, vector<1x512xf32>
    %22 = vector.broadcast %21 : vector<1x512xf32> to vector<16x512xf32>
    %23 = arith.addf %20, %22 : vector<16x512xf32>
    %cst_19 = arith.constant 0.000000e+00 : f32
    %24 = vector.broadcast %cst_19 : f32 to vector<16x512xf32>
    %25 = arith.maximumf %23, %24 : vector<16x512xf32>
    %26 = arith.truncf %25 : vector<16x512xf32> to vector<16x512xbf16>
    %c0_20 = arith.constant 0 : index
    %c0_21 = arith.constant 0 : index
    %27 = vector.load %arg9[%c0_20, %c0_21] : memref<512x128xbf16, #tpu.memory_space<vmem>>, vector<512x128xbf16>
    %cst_22 = arith.constant dense<0.000000e+00> : vector<16x128xf32>
    %28 = tpu.matmul %26, %27, %cst_22 {dimension_numbers = #tpu.dot_dimension_numbers<[1], [0], [0], [1], [0, 0, 1, 1], [], []>} : vector<16x512xbf16>, vector<512x128xbf16>, vector<16x128xf32> -> vector<16x128xf32>
    %c0_23 = arith.constant 0 : index
    %c0_24 = arith.constant 0 : index
    %29 = vector.load %arg10[%c0_23, %c0_24] : memref<1x128xf32, #tpu.memory_space<vmem>>, vector<1x128xf32>
    %30 = vector.broadcast %29 : vector<1x128xf32> to vector<16x128xf32>
    %31 = arith.addf %28, %30 : vector<16x128xf32>
    %c0_25 = arith.constant 0 : index
    %c0_26 = arith.constant 0 : index
    %32 = vector.load %arg11[%c0_25, %c0_26] : memref<16x128xf32, #tpu.memory_space<vmem>>, vector<16x128xf32>
    tpu.vector_store %arg11[%c0_25, %c0_26], %31 {strides = array<i32>} : memref<16x128xf32, #tpu.memory_space<vmem>>, vector<16x128xf32>,
    return
  }
}

</mosaic_0001>

<bundles_post_ra>
// kernel: tpu_custom_call.1
= control target key start
LH: loop header
LB: loop body
LE: loop exit
PB: predicated region body
PF: predicated region fallthrough
CT: control target
= control target key end

     0   :  { %16 = vsyncpa [#allocation3], 0  ;;  %s7223_s0 = inlined_call_operand.hbm [shape: bf16[2,1024], index: 0, kind: input, shape index: {}]   ;;  %s7224_s1 = inlined_call_operand.hbm [shape: bf16[2,768], index: 1, kind: input, shape index: {}]   ;;  %s7225_s2 = inlined_call_operand.hbm [shape: f32[2,512], index: 2, kind: input, shape index: {}]   ;;  %s7226_s3 = inlined_call_operand.hbm [shape: f32[16,512], index: 3, kind: input, shape index: {}]   ;;  %s7227_s4 = inlined_call_operand.hbm [shape: bf16[1024,512], index: 4, kind: input, shape index: {}]   ;;  %s7228_s5 = inlined_call_operand.hbm [shape: bf16[768,512], index: 5, kind: input, shape index: {}]   ;;  %s7229_s6 = inlined_call_operand.vmem [shape: f32[1,512], index: 6, kind: input, shape index: {}]   ;;  %s7230_s7 = inlined_call_operand.hbm [shape: bf16[512,512], index: 7, kind: input, shape index: {}]   ;;  %s7231_s8 = inlined_call_operand.vmem [shape: f32[1,512], index: 8, kind: input, shape index: {}]   ;;  %s7232_s9 = inlined_call_operand.hbm [shape: bf16[512,128], index: 9, kind: input, shape index: {}]   ;;  %s7233_s10 = inlined_call_operand.vmem [shape: f32[1,128], index: 10, kind: input, shape index: {}]   ;;  %s7234_s11 = inlined_call_operand.hbm [shape: f32[16,128], index: 11, kind: output, shape index: {}]  }
   0x1   :  { %17 = vsyncpa [#allocation6], 0 }
   0x2   :  { %18 = vsyncpa [#allocation9], 0 }
   0x3   :  { %19 = vsyncpa [#allocation12], 0 }
   0x4   :  { %20 = vsyncpa [#allocation15], 0 }
   0x5   :  { %21 = vsyncpa [#allocation4], 0  ;;  %s6807_s17 = smov [#allocation5]   ;;  %s6808_s19 = smov [#allocation8]  }
   0x6   :  { %s38_s18 = sshll.u32 %s6807_s17, 4  ;;  %s57_s20 = sshll.u32 %s6808_s19, 4  ;;  %s39_s18 = int_to_ptr.vmem [resolvable:$true] %s38_s18  ;;  %s6886_s20 = int_to_ptr.vmem [resolvable:$true] %s57_s20 }
   0x7   :  { %s6597_s23 = scalar_lea.hbm %s7224_s1, 96 }
   0x8   :  { %p6598_p0 = scmp.ne.s32.totalorder %s7224_s1, %s6597_s23  ;;  %p6601_p1 = scmp.lt.u32.totalorder %s6597_s23, %s7224_s1 }
   0xa   :  { %p6603_p2 = pnand %p6601_p1, %p6598_p0 }
   0xc   :  { %6606 = shalt.err (!%p6603_p2)
}
   0xd   :  { %s6607_s28 = scalar_lea.vmem %s39_s18, 96  ;;  %p6612_p4 = scmp.lt.s32.totalorder %s39_s18, %s39_s18 }
   0xe   :  { %p6608_p3 = scmp.ne.s32.totalorder %s39_s18, %s6607_s28  ;;  %p6613_p5 = scmp.lt.s32.totalorder %s6607_s28, %s6607_s28 }
  0x10   :  { %p6614_p6 = por %p6613_p5, %p6612_p4 }
  0x12   :  { %p6615_p7 = pnand %p6614_p6, %p6608_p3 }
  0x14   :  { %6618 = shalt.err (!%p6615_p7)
}
  0x15   :  { %41 = dma.hbm_to_vmem [thread:$0]  %s7224_s1, 96, %s39_s18, [#allocation6]  }
  0x16   :  { %s6619_s14 = scalar_lea.hbm %s7226_s3, 1024 }
  0x17   :  { %p6620_p8 = scmp.ne.s32.totalorder %s7226_s3, %s6619_s14  ;;  %p6623_p9 = scmp.lt.u32.totalorder %s6619_s14, %s7226_s3 }
  0x19   :  { %p6625_p10 = pnand %p6623_p9, %p6620_p8 }
  0x1b   :  { %6628 = shalt.err (!%p6625_p10)
}
  0x1c   :  { %s6629_s21 = scalar_lea.vmem %s6886_s20, 1024  ;;  %p6634_p12 = scmp.lt.s32.totalorder %s6886_s20, %s6886_s20 }
  0x1d   :  { %p6630_p11 = scmp.ne.s32.totalorder %s6886_s20, %s6629_s21  ;;  %p6635_p13 = scmp.lt.s32.totalorder %s6629_s21, %s6629_s21 }
  0x1f   :  { %p6636_p0 = por %p6635_p13, %p6634_p12 }
  0x21   :  { %p6637_p1 = pnand %p6636_p0, %p6630_p11 }
  0x23   :  { %6640 = shalt.err (!%p6637_p1)
}
  0x24   :  { %s6809_s1 = smov 512   ;;  %s6810_s18 = smov 32  }
  0x25   :  { %63 = dma.hbm_to_vmem [thread:$0]  %s7226_s3, 1024, %s6886_s20, [#allocation9], %s6809_s1, %s6809_s1, %s6810_s18  }
  0x26   :  { %s6811_s24 = smov [#allocation11]   ;;  %s6812_s26 = smov [#allocation2]  }
  0x27   :  { %s81_s25 = sshll.u32 %s6811_s24, 4  ;;  %s28_s27 = sshll.u32 %s6812_s26, 4  ;;  %s82_s25 = int_to_ptr.vmem [resolvable:$true] %s81_s25  ;;  %s29_s27 = int_to_ptr.vmem [resolvable:$true] %s28_s27 }
  0x28   :  { %s6641_s30 = scalar_lea.hbm %s7228_s5, 24576 }
  0x29   :  { %p6642_p2 = scmp.ne.s32.totalorder %s7228_s5, %s6641_s30  ;;  %p6645_p3 = scmp.lt.u32.totalorder %s6641_s30, %s7228_s5 }
  0x2b   :  { %p6647_p4 = pnand %p6645_p3, %p6642_p2 }
  0x2d   :  { %6650 = shalt.err (!%p6647_p4)
}
  0x2e   :  { %s6651_s3 = scalar_lea.vmem %s82_s25, 24576  ;;  %p6656_p6 = scmp.lt.s32.totalorder %s82_s25, %s82_s25 }
  0x2f   :  { %p6652_p5 = scmp.ne.s32.totalorder %s82_s25, %s6651_s3  ;;  %p6657_p7 = scmp.lt.s32.totalorder %s6651_s3, %s6651_s3 }
  0x31   :  { %p6658_p8 = por %p6657_p7, %p6656_p6 }
  0x33   :  { %p6659_p9 = pnand %p6658_p8, %p6652_p5 }
  0x35   :  { %6662 = shalt.err (!%p6659_p9)
}
  0x36   :  { %s6813_s20 = smov 256   ;;  %s6814_s16 = smov 16  }
  0x37   :  { %87 = dma.hbm_to_vmem [thread:$0]  %s7228_s5, 24576, %s82_s25, [#allocation12], %s6813_s20, %s6813_s20, %s6814_s16  }
  0x38   :  { %s6663_s18 = scalar_lea.hbm %s7223_s0, 128 }
  0x39   :  { %p6664_p10 = scmp.ne.s32.totalorder %s7223_s0, %s6663_s18  ;;  %p6667_p11 = scmp.lt.u32.totalorder %s6663_s18, %s7223_s0 }
  0x3b   :  { %p6669_p12 = pnand %p6667_p11, %p6664_p10 }
  0x3d   :  { %6672 = shalt.err (!%p6669_p12)
}
  0x3e   :  { %s6673_s28 = scalar_lea.vmem %s29_s27, 128  ;;  %p6678_p0 = scmp.lt.s32.totalorder %s29_s27, %s29_s27 }
  0x3f   :  { %p6674_p13 = scmp.ne.s32.totalorder %s29_s27, %s6673_s28  ;;  %p6679_p1 = scmp.lt.s32.totalorder %s6673_s28, %s6673_s28 }
  0x41   :  { %p6680_p2 = por %p6679_p1, %p6678_p0 }
  0x43   :  { %p6681_p3 = pnand %p6680_p2, %p6674_p13 }
  0x45   :  { %6684 = shalt.err (!%p6681_p3)
}
  0x46   :  { %31 = dma.hbm_to_vmem [thread:$0]  %s7223_s0, 128, %s29_s27, [#allocation3]  }
  0x47   :  { %s6815_s29 = smov [#allocation7]   ;;  %s6816_s12 = smov [#allocation10]  }
  0x48   :  { %s48_s30 = sshll.u32 %s6815_s29, 4  ;;  %s69_s13 = sshll.u32 %s6816_s12, 4  ;;  %s49_s30 = int_to_ptr.vmem [resolvable:$true] %s48_s30  ;;  %s6944_s13 = int_to_ptr.vmem [resolvable:$true] %s69_s13 }
  0x49   :  { %s6685_s3 = scalar_lea.hbm %s7225_s2, 128 }
  0x4a   :  { %p6686_p4 = scmp.ne.s32.totalorder %s7225_s2, %s6685_s3  ;;  %p6689_p5 = scmp.lt.u32.totalorder %s6685_s3, %s7225_s2 }
  0x4c   :  { %p6691_p6 = pnand %p6689_p5, %p6686_p4 }
  0x4e   :  { %6694 = shalt.err (!%p6691_p6)
}
  0x4f   :  { %s6695_s0 = scalar_lea.vmem %s49_s30, 128  ;;  %p6700_p8 = scmp.lt.s32.totalorder %s49_s30, %s49_s30 }
  0x50   :  { %p6696_p7 = scmp.ne.s32.totalorder %s49_s30, %s6695_s0  ;;  %p6701_p9 = scmp.lt.s32.totalorder %s6695_s0, %s6695_s0 }
  0x52   :  { %p6702_p10 = por %p6701_p9, %p6700_p8 }
  0x54   :  { %p6703_p11 = pnand %p6702_p10, %p6696_p7 }
  0x56   :  { %6706 = shalt.err (!%p6703_p11)
}
  0x57   :  { %51 = dma.hbm_to_vmem [thread:$0]  %s7225_s2, 128, %s49_s30, [#allocation6]  }
  0x58   :  { %s6707_s24 = scalar_lea.hbm %s7227_s4, 32768 }
  0x59   :  { %p6708_p12 = scmp.ne.s32.totalorder %s7227_s4, %s6707_s24  ;;  %p6711_p13 = scmp.lt.u32.totalorder %s6707_s24, %s7227_s4 }
  0x5b   :  { %p6713_p0 = pnand %p6711_p13, %p6708_p12 }
  0x5d   :  { %6716 = shalt.err (!%p6713_p0)
}
  0x5e   :  { %s6717_s29 = scalar_lea.vmem %s6944_s13, 32768  ;;  %p6722_p2 = scmp.lt.s32.totalorder %s6944_s13, %s6944_s13 }
  0x5f   :  { %p6718_p1 = scmp.ne.s32.totalorder %s6944_s13, %s6717_s29  ;;  %p6723_p3 = scmp.lt.s32.totalorder %s6717_s29, %s6717_s29 }
  0x61   :  { %p6724_p4 = por %p6723_p3, %p6722_p2 }
  0x63   :  { %p6725_p5 = pnand %p6724_p4, %p6718_p1 }
  0x65   :  { %6728 = shalt.err (!%p6725_p5)
}
  0x66   :  { %75 = dma.hbm_to_vmem [thread:$0]  %s7227_s4, 32768, %s6944_s13, [#allocation9], %s6813_s20, %s6813_s20, %s6814_s16  }
  0x67   :  { %s6817_s12 = smov [#allocation13]   ;;  %s6818_s15 = smov [#allocation14]  }
  0x68   :  { %s95_s14 = sshll.u32 %s6817_s12, 4  ;;  %s109_s3 = sshll.u32 %s6818_s15, 4  ;;  %s96_s14 = int_to_ptr.vmem [resolvable:$true] %s95_s14  ;;  %s6978_s3 = int_to_ptr.vmem [resolvable:$true] %s109_s3 }
  0x69   :  { %s6729_s21 = scalar_lea.hbm %s7230_s7, 16384 }
  0x6a   :  { %p6730_p6 = scmp.ne.s32.totalorder %s7230_s7, %s6729_s21  ;;  %p6733_p7 = scmp.lt.u32.totalorder %s6729_s21, %s7230_s7 }
  0x6c   :  { %p6735_p8 = pnand %p6733_p7, %p6730_p6 }
  0x6e   :  { %6738 = shalt.err (!%p6735_p8)
}
  0x6f   :  { %s6739_s4 = scalar_lea.vmem %s96_s14, 16384  ;;  %p6744_p10 = scmp.lt.s32.totalorder %s96_s14, %s96_s14 }
  0x70   :  { %p6740_p9 = scmp.ne.s32.totalorder %s96_s14, %s6739_s4  ;;  %p6745_p11 = scmp.lt.s32.totalorder %s6739_s4, %s6739_s4 }
  0x72   :  { %p6746_p12 = por %p6745_p11, %p6744_p10 }
  0x74   :  { %p6747_p13 = pnand %p6746_p12, %p6740_p9 }
  0x76   :  { %6750 = shalt.err (!%p6747_p13)
}
  0x77   :  { %101 = dma.hbm_to_vmem [thread:$0]  %s7230_s7, 16384, %s96_s14, [#allocation12], %s6813_s20, %s6813_s20, %s6814_s16  }
  0x78   :  { %s6751_s26 = scalar_lea.hbm %s7232_s9, 4096 }
  0x79   :  { %p6752_p0 = scmp.ne.s32.totalorder %s7232_s9, %s6751_s26  ;;  %p6755_p1 = scmp.lt.u32.totalorder %s6751_s26, %s7232_s9 }
  0x7b   :  { %p6757_p2 = pnand %p6755_p1, %p6752_p0 }
  0x7d   :  { %6760 = shalt.err (!%p6757_p2)
}
  0x7e   :  { %s6761_s2 = scalar_lea.vmem %s6978_s3, 4096  ;;  %p6766_p4 = scmp.lt.s32.totalorder %s6978_s3, %s6978_s3 }
  0x7f   :  { %p6762_p3 = scmp.ne.s32.totalorder %s6978_s3, %s6761_s2  ;;  %p6767_p5 = scmp.lt.s32.totalorder %s6761_s2, %s6761_s2 }
  0x81   :  { %p6768_p6 = por %p6767_p5, %p6766_p4 }
  0x83   :  { %p6769_p7 = pnand %p6768_p6, %p6762_p3 }
  0x85   :  { %6772 = shalt.err (!%p6769_p7)
}
  0x86   :  { %s6819_s7 = smov 64   ;;  %s6820_s20 = smov 4  }
  0x87   :  { %115 = dma.hbm_to_vmem [thread:$0]  %s7232_s9, 4096, %s6978_s3, [#allocation15], %s6819_s7, %s6819_s7, %s6820_s20  }
  0x88   :  { %6795 = dma.done.wait [#allocation3], 128  }
  0x89   :  { %6796 = vsyncadd [#allocation3], 4294967168 }
  0x8a   :  { %6797 = dma.done.wait [#allocation6], 224  }
  0x8b   :  { %6798 = vsyncadd [#allocation6], 4294967072 }
  0x8c   :  { %6799 = dma.done.wait [#allocation9], 33792  }
  0x8d   :  { %6800 = vsyncadd [#allocation9], 4294933504 }
  0x8e   :  { %6801 = dma.done.wait [#allocation12], 40960  }
  0x8f   :  { %6802 = vsyncadd [#allocation12], 4294926336 }
  0x90   :  { %6803 = dma.done.wait [#allocation15], 4096  }
  0x91   :  { %6804 = vsyncadd [#allocation15], 4294963200  ;;  %v5698_v0 = vld [vmem:[#allocation11 + $0x4] ss:$16 sps:$4 sm:$0xff]   ;;  %v5702_v2 = vld [vmem:[#allocation11] ss:$16 sps:$4 sm:$0xff]   ;;  %v598_v38 = vlaneseq }
  0x92   :  { %v5700_v1 = vld [vmem:[#allocation11 + $0x204] ss:$16 sps:$4 sm:$0xff]   ;;  %1607 = vmatprep.subr.bf16.mxu0 %v5698_v0  ;;  %v5703_v3 = vld [vmem:[#allocation11 + $0x200] ss:$16 sps:$4 sm:$0xff]   ;;  %v6821_v36 = vmov 1966171168  }
  0x93   :  { %1648 = vmatprep.subr.bf16.mxu1 %v5700_v1  ;;  %v5704_v4 = vld [vmem:[#allocation11 + $0x24] ss:$16 sps:$4 sm:$0xff]   ;;  %1608 = vmatpush1.bf16.msra.mxu0 %v5702_v2  ;;  %v5708_v6 = vld [vmem:[#allocation11 + $0x20] ss:$16 sps:$4 sm:$0xff]   ;;  %v596_v37 = vunpack.c.l.s4 %v6821_v36  ;;  %v7012_v43 = vshrl.u32 %v598_v38, 7  ;;  %s6823_s3 = smov [#allocation16]  }
  0x94   :  { %1649 = vmatpush1.bf16.msra.mxu1 %v5703_v3  ;;  %v5706_v5 = vld [vmem:[#allocation11 + $0x224] ss:$16 sps:$4 sm:$0xff]   ;;  %1609 = vmatprep.subr.bf16.mxu0 %v5704_v4  ;;  %v5709_v7 = vld [vmem:[#allocation11 + $0x220] ss:$16 sps:$4 sm:$0xff]   ;;  %v5821_v36 = vld [vmem:[#allocation11 + $0x88] ss:$16 sps:$4 sm:$0xff]  }
  0x95   :  { %1650 = vmatprep.subr.bf16.mxu1 %v5706_v5  ;;  %v5710_v8 = vld [vmem:[#allocation11 + $0x44] ss:$16 sps:$4 sm:$0xff]   ;;  %v5714_v10 = vld [vmem:[#allocation11 + $0x40] ss:$16 sps:$4 sm:$0xff]   ;;  %v597_v42 = vunpack.c.0.s8 %v596_v37  ;;  %v5829_v38 = vld [vmem:[#allocation11 + $0xac] ss:$16 sps:$4 sm:$0xff]  }
  0x96   :  { %v5712_v9 = vld [vmem:[#allocation11 + $0x244] ss:$16 sps:$4 sm:$0xff]   ;;  %v5715_v11 = vld [vmem:[#allocation11 + $0x240] ss:$16 sps:$4 sm:$0xff]   ;;  %s4994_s17 = sshll.u32 %s6823_s3, 4  ;;  %s4995_s17 = int_to_ptr.vmem [resolvable:$true] %s4994_s17 }
  0x97   :  { %1610 = vmatpush1.bf16.msra.mxu0 %v5708_v6  ;;  %v5716_v12 = vld [vmem:[#allocation11 + $0x64] ss:$16 sps:$4 sm:$0xff]   ;;  %v5720_v14 = vld [vmem:[#allocation11 + $0x60] ss:$16 sps:$4 sm:$0xff]   ;;  %v7015_v49 = vsub.s32 %v597_v42, %v7012_v43  ;;  %v5835_v42 = vld [vmem:[#allocation11 + $0xcc] ss:$16 sps:$4 sm:$0xff]   ;;  %p6778_p9 = scmp.lt.s32.totalorder %s4995_s17, %s4995_s17 }
  0x98   :  { %1651 = vmatpush1.bf16.msra.mxu1 %v5709_v7  ;;  %1611 = vmatprep.subr.bf16.mxu0 %v5710_v8  ;;  %v5718_v13 = vld [vmem:[#allocation11 + $0x264] ss:$16 sps:$4 sm:$0xff]   ;;  %v5721_v15 = vld [vmem:[#allocation11 + $0x260] ss:$16 sps:$4 sm:$0xff]  }
  0x99   :  { %1652 = vmatprep.subr.bf16.mxu1 %v5712_v9  ;;  %v5722_v16 = vld [vmem:[#allocation11 + $0x84] ss:$16 sps:$4 sm:$0xff]   ;;  %v5726_v18 = vld [vmem:[#allocation11 + $0x80] ss:$16 sps:$4 sm:$0xff]  }
  0x9a   :  { %v5724_v17 = vld [vmem:[#allocation11 + $0x284] ss:$16 sps:$4 sm:$0xff]   ;;  %v5727_v19 = vld [vmem:[#allocation11 + $0x280] ss:$16 sps:$4 sm:$0xff]  }
  0x9b   :  { %1612 = vmatpush1.bf16.msra.mxu0 %v5714_v10  ;;  %v5728_v20 = vld [vmem:[#allocation11 + $0xa4] ss:$16 sps:$4 sm:$0xff]   ;;  %v5732_v22 = vld [vmem:[#allocation11 + $0xa0] ss:$16 sps:$4 sm:$0xff]  }
  0x9c   :  { %1653 = vmatpush1.bf16.msra.mxu1 %v5715_v11  ;;  %1613 = vmatprep.subr.bf16.mxu0 %v5716_v12  ;;  %v5730_v21 = vld [vmem:[#allocation11 + $0x2a4] ss:$16 sps:$4 sm:$0xff]   ;;  %v5733_v23 = vld [vmem:[#allocation11 + $0x2a0] ss:$16 sps:$4 sm:$0xff]  }
  0x9d   :  { %1654 = vmatprep.subr.bf16.mxu1 %v5718_v13  ;;  %v5734_v24 = vld [vmem:[#allocation11 + $0xc4] ss:$16 sps:$4 sm:$0xff]   ;;  %v5738_v26 = vld [vmem:[#allocation11 + $0xc0] ss:$16 sps:$4 sm:$0xff]  }
  0x9e   :  { %v5736_v25 = vld [vmem:[#allocation11 + $0x2c4] ss:$16 sps:$4 sm:$0xff]   ;;  %v5739_v27 = vld [vmem:[#allocation11 + $0x2c0] ss:$16 sps:$4 sm:$0xff]  }
  0x9f   :  { %1614 = vmatpush1.bf16.msra.mxu0 %v5720_v14  ;;  %v5740_v28 = vld [vmem:[#allocation11 + $0xe4] ss:$16 sps:$4 sm:$0xff]   ;;  %v5744_v30 = vld [vmem:[#allocation11 + $0xe0] ss:$16 sps:$4 sm:$0xff]  }
  0xa0   :  { %1655 = vmatpush1.bf16.msra.mxu1 %v5721_v15  ;;  %1615 = vmatprep.subr.bf16.mxu0 %v5722_v16  ;;  %v5742_v29 = vld [vmem:[#allocation11 + $0x2e4] ss:$16 sps:$4 sm:$0xff]   ;;  %v5745_v31 = vld [vmem:[#allocation11 + $0x2e0] ss:$16 sps:$4 sm:$0xff]   ;;  %v5799_v15 = vld [vmem:[#allocation11 + $0xc] ss:$16 sps:$4 sm:$0xff]  }
  0xa1   :  { %1656 = vmatprep.subr.bf16.mxu1 %v5724_v17  ;;  %v5746_v32 = vld [vmem:[#allocation11 + $0x104] ss:$16 sps:$4 sm:$0xff]   ;;  %v5750_v34 = vld [vmem:[#allocation11 + $0x100] ss:$16 sps:$4 sm:$0xff]  }
  0xa2   :  { %v5748_v33 = vld [vmem:[#allocation11 + $0x304] ss:$16 sps:$4 sm:$0xff]   ;;  %v5751_v35 = vld [vmem:[#allocation11 + $0x300] ss:$16 sps:$4 sm:$0xff]  }
  0xa3   :  { %1616 = vmatpush1.bf16.msra.mxu0 %v5726_v18  ;;  %v5752_v39 = vld [vmem:[#allocation11 + $0x124] ss:$16 sps:$4 sm:$0xff]   ;;  %v5756_v41 = vld [vmem:[#allocation11 + $0x120] ss:$16 sps:$4 sm:$0xff]  }
  0xa4   :  { %1657 = vmatpush1.bf16.msra.mxu1 %v5727_v19  ;;  %1617 = vmatprep.subr.bf16.mxu0 %v5728_v20  ;;  %v5754_v40 = vld [vmem:[#allocation11 + $0x324] ss:$16 sps:$4 sm:$0xff]   ;;  %v5757_v44 = vld [vmem:[#allocation11 + $0x320] ss:$16 sps:$4 sm:$0xff]   ;;  %v5797_v19 = vld [vmem:[#allocation11 + $0x8] ss:$16 sps:$4 sm:$0xff]  }
  0xa5   :  { %1658 = vmatprep.subr.bf16.mxu1 %v5730_v21  ;;  %v5758_v45 = vld [vmem:[#allocation11 + $0x144] ss:$16 sps:$4 sm:$0xff]   ;;  %v5762_v47 = vld [vmem:[#allocation11 + $0x140] ss:$16 sps:$4 sm:$0xff]   ;;  %v5805_v21 = vld [vmem:[#allocation11 + $0x2c] ss:$16 sps:$4 sm:$0xff]  }
  0xa6   :  { %v5760_v46 = vld [vmem:[#allocation11 + $0x344] ss:$16 sps:$4 sm:$0xff]   ;;  %v5763_v48 = vld [vmem:[#allocation11 + $0x340] ss:$16 sps:$4 sm:$0xff]  }
  0xa7   :  { %1618 = vmatpush1.bf16.msra.mxu0 %v5732_v22  ;;  %v5764_v50 = vld [vmem:[#allocation11 + $0x164] ss:$16 sps:$4 sm:$0xff]   ;;  %v5768_v53 = vld [vmem:[#allocation11 + $0x160] ss:$16 sps:$4 sm:$0xff]  }
  0xa8   :  { %1659 = vmatpush1.bf16.msra.mxu1 %v5733_v23  ;;  %1619 = vmatprep.subr.bf16.mxu0 %v5734_v24  ;;  %v5766_v51 = vld [vmem:[#allocation11 + $0x364] ss:$16 sps:$4 sm:$0xff]   ;;  %v5769_v55 = vld [vmem:[#allocation11 + $0x360] ss:$16 sps:$4 sm:$0xff]   ;;  %v5803_v24 = vld [vmem:[#allocation11 + $0x28] ss:$16 sps:$4 sm:$0xff]  }
  0xa9   :  { %1660 = vmatprep.subr.bf16.mxu1 %v5736_v25  ;;  %v400_v52 = vld [vmem:[#allocation5] sm:$0x3f] }
  0xaa   :  { %v601_v54 = vrot.slane %v400_v52, %v7015_v49  ;;  %v5770_v56 = vld [vmem:[#allocation11 + $0x184] ss:$16 sps:$4 sm:$0xff]   ;;  %v5774_v59 = vld [vmem:[#allocation11 + $0x180] ss:$16 sps:$4 sm:$0xff]   ;;  %v594_v5 = vcombine.high %v400_v52, %v400_v52  ;;  %v5847_v52 = vld [vmem:[#allocation11 + $0x10c] ss:$16 sps:$4 sm:$0xff]  }
  0xab   :  { %1620 = vmatpush1.bf16.msra.mxu0 %v5738_v26  ;;  %v5772_v57 = vld [vmem:[#allocation11 + $0x384] ss:$16 sps:$4 sm:$0xff]   ;;  %v5775_v61 = vld [vmem:[#allocation11 + $0x380] ss:$16 sps:$4 sm:$0xff]   ;;  %v5811_v26 = vld [vmem:[#allocation11 + $0x4c] ss:$16 sps:$4 sm:$0xff]  }
  0xac   :  { %1661 = vmatpush1.bf16.msra.mxu1 %v5739_v27  ;;  %1621 = vmatprep.subr.bf16.mxu0 %v5740_v28  ;;  %v609_v58 = vcombine.high %v601_v54, %v601_v54  ;;  %v5776_v62 = vld [vmem:[#allocation11 + $0x1a4] ss:$16 sps:$4 sm:$0xff]   ;;  %v5780_v1 = vld [vmem:[#allocation11 + $0x1a0] ss:$16 sps:$4 sm:$0xff]   ;;  %v7023_v10 = vrot.slane %v594_v5, %v7015_v49  ;;  %v7026_v12 = vrot.slane %v601_v54, %v7015_v49  ;;  %v5809_v28 = vld [vmem:[#allocation11 + $0x48] ss:$16 sps:$4 sm:$0xff]  }
  0xad   :  { %1662 = vmatprep.subr.bf16.mxu1 %v5742_v29  ;;  %v5778_v63 = vld [vmem:[#allocation11 + $0x3a4] ss:$16 sps:$4 sm:$0xff]   ;;  %v5781_v2 = vld [vmem:[#allocation11 + $0x3a0] ss:$16 sps:$4 sm:$0xff]   ;;  %v5845_v54 = vld [vmem:[#allocation11 + $0x108] ss:$16 sps:$4 sm:$0xff]  }
  0xae   :  { %v631_v60 = vrot.slane %v609_v58, %v7015_v49  ;;  %v5782_v3 = vld [vmem:[#allocation11 + $0x1c4] ss:$16 sps:$4 sm:$0xff]   ;;  %v5786_v6 = vld [vmem:[#allocation11 + $0x1c0] ss:$16 sps:$4 sm:$0xff]   ;;  %v610_v16 = vcombine.high %v7023_v10, %v7023_v10  ;;  %v7032_v17 = vcombine.high %v7026_v12, %v7026_v12  ;;  %v5851_v58 = vld [vmem:[#allocation11 + $0x128] ss:$16 sps:$4 sm:$0xff]  }
  0xaf   :  { %1622 = vmatpush1.bf16.msra.mxu0 %v5744_v30  ;;  %v5784_v4 = vld [vmem:[#allocation11 + $0x3c4] ss:$16 sps:$4 sm:$0xff]   ;;  %v5787_v7 = vld [vmem:[#allocation11 + $0x3c0] ss:$16 sps:$4 sm:$0xff]   ;;  %v5817_v30 = vld [vmem:[#allocation11 + $0x6c] ss:$16 sps:$4 sm:$0xff]  }
  0xb0   :  { %1663 = vmatpush1.bf16.msra.mxu1 %v5745_v31  ;;  %1623 = vmatprep.subr.bf16.mxu0 %v5746_v32  ;;  %v7019_v0 = vcombine.high %v631_v60, %v631_v60  ;;  %v5788_v8 = vld [vmem:[#allocation11 + $0x1e4] ss:$16 sps:$4 sm:$0xff]   ;;  %v5792_v11 = vld [vmem:[#allocation11 + $0x1e0] ss:$16 sps:$4 sm:$0xff]   ;;  %v7035_v22 = vrot.slane %v610_v16, %v7015_v49  ;;  %v5815_v32 = vld [vmem:[#allocation11 + $0x68] ss:$16 sps:$4 sm:$0xff]  }
  0xb1   :  { %1664 = vmatprep.subr.bf16.mxu1 %v5748_v33  ;;  %1639 = vmatprep.mubr.bf16.mxu0 %v631_v60  ;;  %v5790_v9 = vld [vmem:[#allocation11 + $0x3e4] ss:$16 sps:$4 sm:$0xff]   ;;  %v5793_v13 = vld [vmem:[#allocation11 + $0x3e0] ss:$16 sps:$4 sm:$0xff]   ;;  %v5871_v5 = vld [vmem:[#allocation11 + $0x18c] ss:$16 sps:$4 sm:$0xff]  }
  0xb2   :  { %1680 = vmatprep.mubr.bf16.mxu1 %v7019_v0  ;;  %v5796_v14 = vld [vmem:[#allocation11 + $0x404] ss:$16 sps:$4 sm:$0xff]   ;;  %v5794_v18 = vld [vmem:[#allocation11 + $0x400] ss:$16 sps:$4 sm:$0xff]  }
  0xb3   :  { %1624 = vmatpush1.bf16.msra.mxu0 %v5750_v34  ;;  %v5802_v20 = vld [vmem:[#allocation11 + $0x424] ss:$16 sps:$4 sm:$0xff]   ;;  %v5800_v23 = vld [vmem:[#allocation11 + $0x420] ss:$16 sps:$4 sm:$0xff]   ;;  %v5823_v34 = vld [vmem:[#allocation11 + $0x8c] ss:$16 sps:$4 sm:$0xff]  }
  0xb4   :  { %1665 = vmatpush1.bf16.msra.mxu1 %v5751_v35  ;;  %1625 = vmatprep.subr.bf16.mxu0 %v5752_v39  ;;  %v5808_v25 = vld [vmem:[#allocation11 + $0x444] ss:$16 sps:$4 sm:$0xff]   ;;  %v5806_v27 = vld [vmem:[#allocation11 + $0x440] ss:$16 sps:$4 sm:$0xff]  }
  0xb5   :  { %1666 = vmatprep.subr.bf16.mxu1 %v5754_v40  ;;  %v5814_v29 = vld [vmem:[#allocation11 + $0x464] ss:$16 sps:$4 sm:$0xff]   ;;  %v5812_v31 = vld [vmem:[#allocation11 + $0x460] ss:$16 sps:$4 sm:$0xff]   ;;  %v5827_v40 = vld [vmem:[#allocation11 + $0xa8] ss:$16 sps:$4 sm:$0xff]  }
  0xb6   :  { %v5820_v33 = vld [vmem:[#allocation11 + $0x484] ss:$16 sps:$4 sm:$0xff]   ;;  %v5818_v35 = vld [vmem:[#allocation11 + $0x480] ss:$16 sps:$4 sm:$0xff]  }
  0xb7   :  { %1626 = vmatpush1.bf16.msra.mxu0 %v5756_v41  ;;  %v5826_v37 = vld [vmem:[#allocation11 + $0x4a4] ss:$16 sps:$4 sm:$0xff]   ;;  %v5824_v39 = vld [vmem:[#allocation11 + $0x4a0] ss:$16 sps:$4 sm:$0xff]  }
  0xb8   :  { %1667 = vmatpush1.bf16.msra.mxu1 %v5757_v44  ;;  %1627 = vmatprep.subr.bf16.mxu0 %v5758_v45  ;;  %v5832_v41 = vld [vmem:[#allocation11 + $0x4c4] ss:$16 sps:$4 sm:$0xff]   ;;  %v5830_v44 = vld [vmem:[#allocation11 + $0x4c0] ss:$16 sps:$4 sm:$0xff]   ;;  %v5833_v45 = vld [vmem:[#allocation11 + $0xc8] ss:$16 sps:$4 sm:$0xff]  }
  0xb9   :  { %1668 = vmatprep.subr.bf16.mxu1 %v5760_v46  ;;  %v5838_v46 = vld [vmem:[#allocation11 + $0x4e4] ss:$16 sps:$4 sm:$0xff]   ;;  %v5878_v16 = vld [vmem:[#allocation11 + $0x5c0] ss:$16 sps:$4 sm:$0xff]  }
  0xbb   :  { %1628 = vmatpush1.bf16.msra.mxu0 %v5762_v47  ;;  %v5841_v47 = vld [vmem:[#allocation11 + $0xec] ss:$16 sps:$4 sm:$0xff]  }
  0xbc   :  { %1669 = vmatpush1.bf16.msra.mxu1 %v5763_v48  ;;  %1629 = vmatprep.subr.bf16.mxu0 %v5764_v50  ;;  %v5836_v48 = vld [vmem:[#allocation11 + $0x4e0] ss:$16 sps:$4 sm:$0xff]   ;;  %v5839_v50 = vld [vmem:[#allocation11 + $0xe8] ss:$16 sps:$4 sm:$0xff]  }
  0xbd   :  { %1670 = vmatprep.subr.bf16.mxu1 %v5766_v51  ;;  %v5844_v51 = vld [vmem:[#allocation11 + $0x504] ss:$16 sps:$4 sm:$0xff]  }
  0xbf   :  { %1630 = vmatpush1.bf16.msra.mxu0 %v5768_v53  ;;  %v5842_v53 = vld [vmem:[#allocation11 + $0x500] ss:$16 sps:$4 sm:$0xff]  }
  0xc0   :  { %1671 = vmatpush1.bf16.msra.mxu1 %v5769_v55  ;;  %1631 = vmatprep.subr.bf16.mxu0 %v5770_v56  ;;  %v5850_v55 = vld [vmem:[#allocation11 + $0x524] ss:$16 sps:$4 sm:$0xff]   ;;  %v5853_v56 = vld [vmem:[#allocation11 + $0x12c] ss:$16 sps:$4 sm:$0xff]  }
  0xc1   :  { %1672 = vmatprep.subr.bf16.mxu1 %v5772_v57  ;;  %v5848_v57 = vld [vmem:[#allocation11 + $0x520] ss:$16 sps:$4 sm:$0xff]  }
  0xc3   :  { %1632 = vmatpush1.bf16.msra.mxu0 %v5774_v59  ;;  %v5856_v59 = vld [vmem:[#allocation11 + $0x544] ss:$16 sps:$4 sm:$0xff]  }
  0xc4   :  { %1673 = vmatpush1.bf16.msra.mxu1 %v5775_v61  ;;  %1633 = vmatprep.subr.bf16.mxu0 %v5776_v62  ;;  %v5854_v61 = vld [vmem:[#allocation11 + $0x540] ss:$16 sps:$4 sm:$0xff]   ;;  %v5857_v62 = vld [vmem:[#allocation11 + $0x148] ss:$16 sps:$4 sm:$0xff]  }
  0xc5   :  { %1674 = vmatprep.subr.bf16.mxu1 %v5778_v63  ;;  %v5862_v63 = vld [vmem:[#allocation11 + $0x564] ss:$16 sps:$4 sm:$0xff]  }
  0xc7   :  { %1634 = vmatpush1.bf16.msra.mxu0 %v5780_v1  ;;  %v5865_v1 = vld [vmem:[#allocation11 + $0x16c] ss:$16 sps:$4 sm:$0xff]  }
  0xc8   :  { %1675 = vmatpush1.bf16.msra.mxu1 %v5781_v2  ;;  %1635 = vmatprep.subr.bf16.mxu0 %v5782_v3  ;;  %v5860_v2 = vld [vmem:[#allocation11 + $0x560] ss:$16 sps:$4 sm:$0xff]   ;;  %v5863_v3 = vld [vmem:[#allocation11 + $0x168] ss:$16 sps:$4 sm:$0xff]  }
  0xc9   :  { %1676 = vmatprep.subr.bf16.mxu1 %v5784_v4  ;;  %v5868_v4 = vld [vmem:[#allocation11 + $0x584] ss:$16 sps:$4 sm:$0xff]  }
  0xcb   :  { %1636 = vmatpush1.bf16.msra.mxu0 %v5786_v6  ;;  %v5866_v6 = vld [vmem:[#allocation11 + $0x580] ss:$16 sps:$4 sm:$0xff]  }
  0xcc   :  { %1677 = vmatpush1.bf16.msra.mxu1 %v5787_v7  ;;  %1637 = vmatprep.subr.bf16.mxu0 %v5788_v8  ;;  %v5869_v7 = vld [vmem:[#allocation11 + $0x188] ss:$16 sps:$4 sm:$0xff]   ;;  %v5874_v8 = vld [vmem:[#allocation11 + $0x5a4] ss:$16 sps:$4 sm:$0xff]  }
  0xcd   :  { %1678 = vmatprep.subr.bf16.mxu1 %v5790_v9  ;;  %v5877_v9 = vld [vmem:[#allocation11 + $0x1ac] ss:$16 sps:$4 sm:$0xff]  }
  0xcf   :  { %1638 = vmatpush1.bf16.msra.mxu0 %v5792_v11  ;;  %v5872_v11 = vld [vmem:[#allocation11 + $0x5a0] ss:$16 sps:$4 sm:$0xff]  }
  0xd0   :  { %1679 = vmatpush1.bf16.msra.mxu1 %v5793_v13  ;;  %1689 = vmatprep.subr.bf16.mxu0 %v5796_v14  ;;  %v5875_v13 = vld [vmem:[#allocation11 + $0x1a8] ss:$16 sps:$4 sm:$0xff]   ;;  %v5880_v14 = vld [vmem:[#allocation11 + $0x5c4] ss:$16 sps:$4 sm:$0xff]  }
  0xd1   :  { %1730 = vmatprep.subr.bf16.mxu1 %v5799_v15  ;;  %v5883_v15 = vld [vmem:[#allocation11 + $0x1cc] ss:$16 sps:$4 sm:$0xff]  }
  0xd2   :  { %1640 = vmatmul.mubr.bf16.vlgmr.msra.gmra.mrb[0].mxu0 %v7026_v12 }
  0xd3   :  { %1681 = vmatmul.mubr.bf16.vlgmr.msra.gmra.mrb[0].mxu1 %v7032_v17  ;;  %1690 = vmatpush1.bf16.msra.mxu0 %v5794_v18  ;;  %v5881_v18 = vld [vmem:[#allocation11 + $0x1c8] ss:$16 sps:$4 sm:$0xff]  }
  0xd4   :  { %1731 = vmatpush1.bf16.msra.mxu1 %v5797_v19  ;;  %1691 = vmatprep.subr.bf16.mxu0 %v5802_v20  ;;  %v5886_v19 = vld [vmem:[#allocation11 + $0x5e4] ss:$16 sps:$4 sm:$0xff]   ;;  %v5889_v20 = vld [vmem:[#allocation11 + $0x1ec] ss:$16 sps:$4 sm:$0xff]  }
  0xd5   :  { %1732 = vmatprep.subr.bf16.mxu1 %v5805_v21  ;;  %1721 = vmatprep.mubr.bf16.mxu0 %v7035_v22  ;;  %v5884_v21 = vld [vmem:[#allocation11 + $0x5e0] ss:$16 sps:$4 sm:$0xff]  }
  0xd6   :  { %1762 = vmatprep.mubr.bf16.mxu1 %v631_v60  ;;  %v5859_v60 = vld [vmem:[#allocation11 + $0x14c] ss:$16 sps:$4 sm:$0xff]  }
  0xd7   :  { %1692 = vmatpush1.bf16.msra.mxu0 %v5800_v23  ;;  %v5887_v23 = vld [vmem:[#allocation11 + $0x1e8] ss:$16 sps:$4 sm:$0xff]  }
  0xd8   :  { %1733 = vmatpush1.bf16.msra.mxu1 %v5803_v24  ;;  %1693 = vmatprep.subr.bf16.mxu0 %v5808_v25  ;;  %v5893_v24 = vld [vmem:[#allocation11 + $0x20c] ss:$16 sps:$4 sm:$0xff]  }
  0xd9   :  { %1734 = vmatprep.subr.bf16.mxu1 %v5811_v26  ;;  %v5896_v25 = vld [vmem:[#allocation11 + $0x40c] ss:$16 sps:$4 sm:$0xff]   ;;  %v7042_v26 = vrot.slane %v7023_v10, %v7015_v49 }
  0xda   :  { %v5905_v10 = vld [vmem:[#allocation11 + $0x24c] ss:$16 sps:$4 sm:$0xff]  }
  0xdb   :  { %1694 = vmatpush1.bf16.msra.mxu0 %v5806_v27  ;;  %v5891_v27 = vld [vmem:[#allocation11 + $0x208] ss:$16 sps:$4 sm:$0xff]  }
  0xdc   :  { %1735 = vmatpush1.bf16.msra.mxu1 %v5809_v28  ;;  %1695 = vmatprep.subr.bf16.mxu0 %v5814_v29  ;;  %v5894_v28 = vld [vmem:[#allocation11 + $0x408] ss:$16 sps:$4 sm:$0xff]   ;;  %v5899_v29 = vld [vmem:[#allocation11 + $0x22c] ss:$16 sps:$4 sm:$0xff]  }
  0xdd   :  { %1736 = vmatprep.subr.bf16.mxu1 %v5817_v30  ;;  %v5902_v30 = vld [vmem:[#allocation11 + $0x42c] ss:$16 sps:$4 sm:$0xff]  }
  0xdf   :  { %1696 = vmatpush1.bf16.msra.mxu0 %v5812_v31  ;;  %v5897_v31 = vld [vmem:[#allocation11 + $0x228] ss:$16 sps:$4 sm:$0xff]  }
  0xe0   :  { %1737 = vmatpush1.bf16.msra.mxu1 %v5815_v32  ;;  %1697 = vmatprep.subr.bf16.mxu0 %v5820_v33  ;;  %v5900_v32 = vld [vmem:[#allocation11 + $0x428] ss:$16 sps:$4 sm:$0xff]   ;;  %v5908_v33 = vld [vmem:[#allocation11 + $0x44c] ss:$16 sps:$4 sm:$0xff]  }
  0xe1   :  { %1738 = vmatprep.subr.bf16.mxu1 %v5823_v34  ;;  %v5903_v34 = vld [vmem:[#allocation11 + $0x248] ss:$16 sps:$4 sm:$0xff]  }
  0xe3   :  { %1698 = vmatpush1.bf16.msra.mxu0 %v5818_v35  ;;  %v5906_v35 = vld [vmem:[#allocation11 + $0x448] ss:$16 sps:$4 sm:$0xff]  }
  0xe4   :  { %1739 = vmatpush1.bf16.msra.mxu1 %v5821_v36  ;;  %1699 = vmatprep.subr.bf16.mxu0 %v5826_v37  ;;  %v5911_v36 = vld [vmem:[#allocation11 + $0x26c] ss:$16 sps:$4 sm:$0xff]   ;;  %v5909_v37 = vld [vmem:[#allocation11 + $0x268] ss:$16 sps:$4 sm:$0xff]  }
  0xe5   :  { %1740 = vmatprep.subr.bf16.mxu1 %v5829_v38  ;;  %v5912_v38 = vld [vmem:[#allocation11 + $0x468] ss:$16 sps:$4 sm:$0xff]  }
  0xe7   :  { %1700 = vmatpush1.bf16.msra.mxu0 %v5824_v39  ;;  %v5917_v39 = vld [vmem:[#allocation11 + $0x28c] ss:$16 sps:$4 sm:$0xff]  }
  0xe8   :  { %1741 = vmatpush1.bf16.msra.mxu1 %v5827_v40  ;;  %1701 = vmatprep.subr.bf16.mxu0 %v5832_v41  ;;  %v5920_v40 = vld [vmem:[#allocation11 + $0x48c] ss:$16 sps:$4 sm:$0xff]   ;;  %v5915_v41 = vld [vmem:[#allocation11 + $0x288] ss:$16 sps:$4 sm:$0xff]  }
  0xe9   :  { %1742 = vmatprep.subr.bf16.mxu1 %v5835_v42  ;;  %v5926_v42 = vld [vmem:[#allocation11 + $0x4ac] ss:$16 sps:$4 sm:$0xff]  }
  0xeb   :  { %1702 = vmatpush1.bf16.msra.mxu0 %v5830_v44  ;;  %v5921_v44 = vld [vmem:[#allocation11 + $0x2a8] ss:$16 sps:$4 sm:$0xff]  }
  0xec   :  { %1743 = vmatpush1.bf16.msra.mxu1 %v5833_v45  ;;  %1703 = vmatprep.subr.bf16.mxu0 %v5838_v46  ;;  %v5924_v45 = vld [vmem:[#allocation11 + $0x4a8] ss:$16 sps:$4 sm:$0xff]   ;;  %v5929_v46 = vld [vmem:[#allocation11 + $0x2cc] ss:$16 sps:$4 sm:$0xff]  }
  0xed   :  { %1744 = vmatprep.subr.bf16.mxu1 %v5841_v47  ;;  %v5932_v47 = vld [vmem:[#allocation11 + $0x4cc] ss:$16 sps:$4 sm:$0xff]  }
  0xef   :  { %1704 = vmatpush1.bf16.msra.mxu0 %v5836_v48  ;;  %v5927_v48 = vld [vmem:[#allocation11 + $0x2c8] ss:$16 sps:$4 sm:$0xff]  }
  0xf0   :  { %1745 = vmatpush1.bf16.msra.mxu1 %v5839_v50  ;;  %1705 = vmatprep.subr.bf16.mxu0 %v5844_v51  ;;  %v5930_v50 = vld [vmem:[#allocation11 + $0x4c8] ss:$16 sps:$4 sm:$0xff]   ;;  %v5935_v51 = vld [vmem:[#allocation11 + $0x2ec] ss:$16 sps:$4 sm:$0xff]  }
  0xf1   :  { %1746 = vmatprep.subr.bf16.mxu1 %v5847_v52  ;;  %v5938_v52 = vld [vmem:[#allocation11 + $0x4ec] ss:$16 sps:$4 sm:$0xff]  }
  0xf3   :  { %1706 = vmatpush1.bf16.msra.mxu0 %v5842_v53  ;;  %v5933_v53 = vld [vmem:[#allocation11 + $0x2e8] ss:$16 sps:$4 sm:$0xff]  }
  0xf4   :  { %1747 = vmatpush1.bf16.msra.mxu1 %v5845_v54  ;;  %1707 = vmatprep.subr.bf16.mxu0 %v5850_v55  ;;  %v5936_v54 = vld [vmem:[#allocation11 + $0x4e8] ss:$16 sps:$4 sm:$0xff]   ;;  %v5941_v55 = vld [vmem:[#allocation11 + $0x30c] ss:$16 sps:$4 sm:$0xff]  }
  0xf5   :  { %1748 = vmatprep.subr.bf16.mxu1 %v5853_v56  ;;  %v5944_v56 = vld [vmem:[#allocation11 + $0x50c] ss:$16 sps:$4 sm:$0xff]  }
  0xf7   :  { %1708 = vmatpush1.bf16.msra.mxu0 %v5848_v57  ;;  %v5939_v57 = vld [vmem:[#allocation11 + $0x308] ss:$16 sps:$4 sm:$0xff]  }
  0xf8   :  { %1749 = vmatpush1.bf16.msra.mxu1 %v5851_v58  ;;  %1709 = vmatprep.subr.bf16.mxu0 %v5856_v59  ;;  %v5942_v58 = vld [vmem:[#allocation11 + $0x508] ss:$16 sps:$4 sm:$0xff]   ;;  %v5947_v59 = vld [vmem:[#allocation11 + $0x32c] ss:$16 sps:$4 sm:$0xff]  }
  0xf9   :  { %1750 = vmatprep.subr.bf16.mxu1 %v5859_v60  ;;  %v5950_v60 = vld [vmem:[#allocation11 + $0x52c] ss:$16 sps:$4 sm:$0xff]  }
  0xfb   :  { %1710 = vmatpush1.bf16.msra.mxu0 %v5854_v61  ;;  %v5945_v61 = vld [vmem:[#allocation11 + $0x328] ss:$16 sps:$4 sm:$0xff]  }
  0xfc   :  { %1751 = vmatpush1.bf16.msra.mxu1 %v5857_v62  ;;  %1711 = vmatprep.subr.bf16.mxu0 %v5862_v63  ;;  %v5948_v62 = vld [vmem:[#allocation11 + $0x528] ss:$16 sps:$4 sm:$0xff]   ;;  %v5953_v63 = vld [vmem:[#allocation11 + $0x34c] ss:$16 sps:$4 sm:$0xff]  }
  0xfd   :  { %1752 = vmatprep.subr.bf16.mxu1 %v5865_v1  ;;  %v5956_v1 = vld [vmem:[#allocation11 + $0x54c] ss:$16 sps:$4 sm:$0xff]  }
  0xff   :  { %1712 = vmatpush1.bf16.msra.mxu0 %v5860_v2  ;;  %v5951_v2 = vld [vmem:[#allocation11 + $0x348] ss:$16 sps:$4 sm:$0xff]  }
 0x100   :  { %1753 = vmatpush1.bf16.msra.mxu1 %v5863_v3  ;;  %1713 = vmatprep.subr.bf16.mxu0 %v5868_v4  ;;  %v5954_v3 = vld [vmem:[#allocation11 + $0x548] ss:$16 sps:$4 sm:$0xff]   ;;  %v5959_v4 = vld [vmem:[#allocation11 + $0x36c] ss:$16 sps:$4 sm:$0xff]  }
 0x101   :  { %1754 = vmatprep.subr.bf16.mxu1 %v5871_v5  ;;  %v5962_v5 = vld [vmem:[#allocation11 + $0x56c] ss:$16 sps:$4 sm:$0xff]  }
 0x103   :  { %1714 = vmatpush1.bf16.msra.mxu0 %v5866_v6  ;;  %v5957_v6 = vld [vmem:[#allocation11 + $0x368] ss:$16 sps:$4 sm:$0xff]  }
 0x104   :  { %1755 = vmatpush1.bf16.msra.mxu1 %v5869_v7  ;;  %1715 = vmatprep.subr.bf16.mxu0 %v5874_v8  ;;  %v5960_v7 = vld [vmem:[#allocation11 + $0x568] ss:$16 sps:$4 sm:$0xff]   ;;  %v5965_v8 = vld [vmem:[#allocation11 + $0x38c] ss:$16 sps:$4 sm:$0xff]  }
 0x105   :  { %1756 = vmatprep.subr.bf16.mxu1 %v5877_v9  ;;  %v5968_v9 = vld [vmem:[#allocation11 + $0x58c] ss:$16 sps:$4 sm:$0xff]  }
 0x107   :  { %1716 = vmatpush1.bf16.msra.mxu0 %v5872_v11  ;;  %v5963_v11 = vld [vmem:[#allocation11 + $0x388] ss:$16 sps:$4 sm:$0xff]  }
 0x108   :  { %1757 = vmatpush1.bf16.msra.mxu1 %v5875_v13  ;;  %1717 = vmatprep.subr.bf16.mxu0 %v5880_v14  ;;  %v5966_v13 = vld [vmem:[#allocation11 + $0x588] ss:$16 sps:$4 sm:$0xff]   ;;  %v5971_v14 = vld [vmem:[#allocation11 + $0x3ac] ss:$16 sps:$4 sm:$0xff]  }
 0x109   :  { %1758 = vmatprep.subr.bf16.mxu1 %v5883_v15  ;;  %v5974_v15 = vld [vmem:[#allocation11 + $0x5ac] ss:$16 sps:$4 sm:$0xff]  }
 0x10b   :  { %1718 = vmatpush1.bf16.msra.mxu0 %v5878_v16  ;;  %v7048_v16 = vld [vmem:[#allocation2] sm:$0xff] }
 0x10c   :  { %1759 = vmatpush1.bf16.msra.mxu1 %v5881_v18  ;;  %1719 = vmatprep.subr.bf16.mxu0 %v5886_v19  ;;  %v5969_v18 = vld [vmem:[#allocation11 + $0x3a8] ss:$16 sps:$4 sm:$0xff]  }
 0x10d   :  { %1760 = vmatprep.subr.bf16.mxu1 %v5889_v20  ;;  %v5972_v19 = vld [vmem:[#allocation11 + $0x5a8] ss:$16 sps:$4 sm:$0xff]   ;;  %v5977_v20 = vld [vmem:[#allocation11 + $0x3cc] ss:$16 sps:$4 sm:$0xff]  }
 0x10f   :  { %1720 = vmatpush1.bf16.msra.mxu0 %v5884_v21  ;;  %v5980_v21 = vld [vmem:[#allocation11 + $0x5cc] ss:$16 sps:$4 sm:$0xff]  }
 0x110   :  { %1761 = vmatpush1.bf16.msra.mxu1 %v5887_v23  ;;  %1771 = vmatprep.subr.bf16.mxu0 %v5893_v24  ;;  %v7052_v23 = vrot.slane %v7048_v16, %v7015_v49  ;;  %v5975_v24 = vld [vmem:[#allocation11 + $0x3c8] ss:$16 sps:$4 sm:$0xff]  }
 0x111   :  { %1812 = vmatprep.subr.bf16.mxu1 %v5896_v25  ;;  %v5978_v25 = vld [vmem:[#allocation11 + $0x5c8] ss:$16 sps:$4 sm:$0xff]  }
 0x112   :  { %1722 = vmatmul.mubr.bf16.vlgmr.msra.gmra.mrb[4].mxu0 %v7042_v26 }
 0x113   :  { %1763 = vmatmul.mubr.bf16.vlgmr.msra.gmra.mrb[4].mxu1 %v7026_v12  ;;  %1772 = vmatpush1.bf16.msra.mxu0 %v5891_v27  ;;  %v5914_v12 = vld [vmem:[#allocation11 + $0x46c] ss:$16 sps:$4 sm:$0xff]  }
 0x114   :  { %1813 = vmatpush1.bf16.msra.mxu1 %v5894_v28  ;;  %1773 = vmatprep.subr.bf16.mxu0 %v5899_v29  ;;  %v5983_v27 = vld [vmem:[#allocation11 + $0x3ec] ss:$16 sps:$4 sm:$0xff]   ;;  %v1869_v29 = vcombine.high %v7052_v23, %v7052_v23 }
 0x115   :  { %1814 = vmatprep.subr.bf16.mxu1 %v5902_v30  ;;  %1803 = vmatprep.mubr.bf16.mxu0 %v7019_v0  ;;  %v5918_v0 = vld [vmem:[#allocation11 + $0x488] ss:$16 sps:$4 sm:$0xff]   ;;  %v5986_v28 = vld [vmem:[#allocation11 + $0x5ec] ss:$16 sps:$4 sm:$0xff]  }
 0x116   :  { %1844 = vmatprep.mubr.bf16.mxu1 %v7035_v22  ;;  %v5923_v22 = vld [vmem:[#allocation11 + $0x2ac] ss:$16 sps:$4 sm:$0xff]   ;;  %v5981_v30 = vld [vmem:[#allocation11 + $0x3e8] ss:$16 sps:$4 sm:$0xff]  }
 0x117   :  { %1774 = vmatpush1.bf16.msra.mxu0 %v5897_v31  ;;  %v5984_v31 = vld [vmem:[#allocation11 + $0x5e8] ss:$16 sps:$4 sm:$0xff]  }
 0x118   :  { %1815 = vmatpush1.bf16.msra.mxu1 %v5900_v32  ;;  %1775 = vmatprep.subr.bf16.mxu0 %v5905_v10  ;;  %v5989_v32 = vld [vmem:[#allocation10 + $0x4] ss:$16 sps:$4 sm:$0xff]  }
 0x119   :  { %1816 = vmatprep.subr.bf16.mxu1 %v5908_v33  ;;  %v5992_v10 = vld [vmem:[#allocation10 + $0x204] ss:$16 sps:$4 sm:$0xff]   ;;  %v7057_v33 = vrot.slane %v1869_v29, %v7015_v49  ;;  %v6065_v29 = vld [vmem:[#allocation10 + $0x1a0] ss:$16 sps:$4 sm:$0xff]  }
 0x11b   :  { %1776 = vmatpush1.bf16.msra.mxu0 %v5903_v34  ;;  %v5987_v34 = vld [vmem:[#allocation10] ss:$16 sps:$4 sm:$0xff]  }
 0x11c   :  { %1817 = vmatpush1.bf16.msra.mxu1 %v5906_v35  ;;  %1777 = vmatprep.subr.bf16.mxu0 %v5911_v36  ;;  %v5990_v35 = vld [vmem:[#allocation10 + $0x200] ss:$16 sps:$4 sm:$0xff]   ;;  %v5995_v36 = vld [vmem:[#allocation10 + $0x24] ss:$16 sps:$4 sm:$0xff]  }
 0x11d   :  { %1818 = vmatprep.subr.bf16.mxu1 %v5914_v12  ;;  %v5998_v12 = vld [vmem:[#allocation10 + $0x224] ss:$16 sps:$4 sm:$0xff]  }
 0x11f   :  { %1778 = vmatpush1.bf16.msra.mxu0 %v5909_v37  ;;  %v7061_v37 = vcombine.high %v7057_v33, %v7057_v33 }
 0x120   :  { %1819 = vmatpush1.bf16.msra.mxu1 %v5912_v38  ;;  %1779 = vmatprep.subr.bf16.mxu0 %v5917_v39  ;;  %v5993_v38 = vld [vmem:[#allocation10 + $0x20] ss:$16 sps:$4 sm:$0xff]  }
 0x121   :  { %1820 = vmatprep.subr.bf16.mxu1 %v5920_v40  ;;  %v5996_v39 = vld [vmem:[#allocation10 + $0x220] ss:$16 sps:$4 sm:$0xff]   ;;  %v6001_v40 = vld [vmem:[#allocation10 + $0x44] ss:$16 sps:$4 sm:$0xff]  }
 0x123   :  { %1780 = vmatpush1.bf16.msra.mxu0 %v5915_v41  ;;  %v6004_v41 = vld [vmem:[#allocation10 + $0x244] ss:$16 sps:$4 sm:$0xff]  }
 0x124   :  { %1821 = vmatpush1.bf16.msra.mxu1 %v5918_v0  ;;  %1781 = vmatprep.subr.bf16.mxu0 %v5923_v22  ;;  %v5999_v0 = vld [vmem:[#allocation10 + $0x40] ss:$16 sps:$4 sm:$0xff]  }
 0x125   :  { %1822 = vmatprep.subr.bf16.mxu1 %v5926_v42  ;;  %v6002_v22 = vld [vmem:[#allocation10 + $0x240] ss:$16 sps:$4 sm:$0xff]  }
 0x126   :  { %v6005_v42 = vld [vmem:[#allocation10 + $0x60] ss:$16 sps:$4 sm:$0xff]  }
 0x127   :  { %1782 = vmatpush1.bf16.msra.mxu0 %v5921_v44  ;;  %v6008_v44 = vld [vmem:[#allocation10 + $0x260] ss:$16 sps:$4 sm:$0xff]  }
 0x128   :  { %1823 = vmatpush1.bf16.msra.mxu1 %v5924_v45  ;;  %1783 = vmatprep.subr.bf16.mxu0 %v5929_v46  ;;  %v6013_v45 = vld [vmem:[#allocation10 + $0x84] ss:$16 sps:$4 sm:$0xff]  }
 0x129   :  { %1824 = vmatprep.subr.bf16.mxu1 %v5932_v47  ;;  %v6016_v46 = vld [vmem:[#allocation10 + $0x284] ss:$16 sps:$4 sm:$0xff]   ;;  %v6011_v47 = vld [vmem:[#allocation10 + $0x80] ss:$16 sps:$4 sm:$0xff]  }
 0x12b   :  { %1784 = vmatpush1.bf16.msra.mxu0 %v5927_v48  ;;  %v6014_v48 = vld [vmem:[#allocation10 + $0x280] ss:$16 sps:$4 sm:$0xff]  }
 0x12c   :  { %1825 = vmatpush1.bf16.msra.mxu1 %v5930_v50  ;;  %1785 = vmatprep.subr.bf16.mxu0 %v5935_v51  ;;  %v6019_v50 = vld [vmem:[#allocation10 + $0xa4] ss:$16 sps:$4 sm:$0xff]  }
 0x12d   :  { %1826 = vmatprep.subr.bf16.mxu1 %v5938_v52  ;;  %v6022_v51 = vld [vmem:[#allocation10 + $0x2a4] ss:$16 sps:$4 sm:$0xff]   ;;  %v6017_v52 = vld [vmem:[#allocation10 + $0xa0] ss:$16 sps:$4 sm:$0xff]  }
 0x12f   :  { %1786 = vmatpush1.bf16.msra.mxu0 %v5933_v53  ;;  %v6020_v53 = vld [vmem:[#allocation10 + $0x2a0] ss:$16 sps:$4 sm:$0xff]  }
 0x130   :  { %1827 = vmatpush1.bf16.msra.mxu1 %v5936_v54  ;;  %1787 = vmatprep.subr.bf16.mxu0 %v5941_v55  ;;  %v6025_v54 = vld [vmem:[#allocation10 + $0xc4] ss:$16 sps:$4 sm:$0xff]  }
 0x131   :  { %1828 = vmatprep.subr.bf16.mxu1 %v5944_v56  ;;  %v6028_v55 = vld [vmem:[#allocation10 + $0x2c4] ss:$16 sps:$4 sm:$0xff]   ;;  %v6023_v56 = vld [vmem:[#allocation10 + $0xc0] ss:$16 sps:$4 sm:$0xff]  }
 0x133   :  { %1788 = vmatpush1.bf16.msra.mxu0 %v5939_v57  ;;  %v6026_v57 = vld [vmem:[#allocation10 + $0x2c0] ss:$16 sps:$4 sm:$0xff]  }
 0x134   :  { %1829 = vmatpush1.bf16.msra.mxu1 %v5942_v58  ;;  %1789 = vmatprep.subr.bf16.mxu0 %v5947_v59  ;;  %v6031_v58 = vld [vmem:[#allocation10 + $0xe4] ss:$16 sps:$4 sm:$0xff]  }
 0x135   :  { %1830 = vmatprep.subr.bf16.mxu1 %v5950_v60  ;;  %v6034_v59 = vld [vmem:[#allocation10 + $0x2e4] ss:$16 sps:$4 sm:$0xff]   ;;  %v6029_v60 = vld [vmem:[#allocation10 + $0xe0] ss:$16 sps:$4 sm:$0xff]  }
 0x137   :  { %1790 = vmatpush1.bf16.msra.mxu0 %v5945_v61  ;;  %v6032_v61 = vld [vmem:[#allocation10 + $0x2e0] ss:$16 sps:$4 sm:$0xff]  }
 0x138   :  { %1831 = vmatpush1.bf16.msra.mxu1 %v5948_v62  ;;  %1791 = vmatprep.subr.bf16.mxu0 %v5953_v63  ;;  %v6037_v62 = vld [vmem:[#allocation10 + $0x104] ss:$16 sps:$4 sm:$0xff]  }
 0x139   :  { %1832 = vmatprep.subr.bf16.mxu1 %v5956_v1  ;;  %v6040_v63 = vld [vmem:[#allocation10 + $0x304] ss:$16 sps:$4 sm:$0xff]   ;;  %v6035_v1 = vld [vmem:[#allocation10 + $0x100] ss:$16 sps:$4 sm:$0xff]  }
 0x13b   :  { %1792 = vmatpush1.bf16.msra.mxu0 %v5951_v2  ;;  %v6038_v2 = vld [vmem:[#allocation10 + $0x300] ss:$16 sps:$4 sm:$0xff]  }
 0x13c   :  { %1833 = vmatpush1.bf16.msra.mxu1 %v5954_v3  ;;  %1793 = vmatprep.subr.bf16.mxu0 %v5959_v4  ;;  %v6043_v3 = vld [vmem:[#allocation10 + $0x124] ss:$16 sps:$4 sm:$0xff]  }
 0x13d   :  { %1834 = vmatprep.subr.bf16.mxu1 %v5962_v5  ;;  %v6046_v4 = vld [vmem:[#allocation10 + $0x324] ss:$16 sps:$4 sm:$0xff]   ;;  %v6041_v5 = vld [vmem:[#allocation10 + $0x120] ss:$16 sps:$4 sm:$0xff]  }
 0x13f   :  { %1794 = vmatpush1.bf16.msra.mxu0 %v5957_v6  ;;  %v6044_v6 = vld [vmem:[#allocation10 + $0x320] ss:$16 sps:$4 sm:$0xff]  }
 0x140   :  { %1835 = vmatpush1.bf16.msra.mxu1 %v5960_v7  ;;  %1795 = vmatprep.subr.bf16.mxu0 %v5965_v8  ;;  %v6049_v7 = vld [vmem:[#allocation10 + $0x144] ss:$16 sps:$4 sm:$0xff]  }
 0x141   :  { %1836 = vmatprep.subr.bf16.mxu1 %v5968_v9  ;;  %v6052_v8 = vld [vmem:[#allocation10 + $0x344] ss:$16 sps:$4 sm:$0xff]   ;;  %v6047_v9 = vld [vmem:[#allocation10 + $0x140] ss:$16 sps:$4 sm:$0xff]  }
 0x143   :  { %1796 = vmatpush1.bf16.msra.mxu0 %v5963_v11  ;;  %v6050_v11 = vld [vmem:[#allocation10 + $0x340] ss:$16 sps:$4 sm:$0xff]  }
 0x144   :  { %1837 = vmatpush1.bf16.msra.mxu1 %v5966_v13  ;;  %1797 = vmatprep.subr.bf16.mxu0 %v5971_v14  ;;  %v6055_v13 = vld [vmem:[#allocation10 + $0x164] ss:$16 sps:$4 sm:$0xff]  }
 0x145   :  { %1838 = vmatprep.subr.bf16.mxu1 %v5974_v15  ;;  %v6058_v14 = vld [vmem:[#allocation10 + $0x364] ss:$16 sps:$4 sm:$0xff]   ;;  %v6053_v15 = vld [vmem:[#allocation10 + $0x160] ss:$16 sps:$4 sm:$0xff]  }
 0x147   :  { %1798 = vmatpush1.bf16.msra.mxu0 %v5969_v18  ;;  %v6056_v18 = vld [vmem:[#allocation10 + $0x360] ss:$16 sps:$4 sm:$0xff]  }
 0x148   :  { %1839 = vmatpush1.bf16.msra.mxu1 %v5972_v19  ;;  %1799 = vmatprep.subr.bf16.mxu0 %v5977_v20  ;;  %v6061_v19 = vld [vmem:[#allocation10 + $0x184] ss:$16 sps:$4 sm:$0xff]  }
 0x149   :  { %1840 = vmatprep.subr.bf16.mxu1 %v5980_v21  ;;  %v6064_v20 = vld [vmem:[#allocation10 + $0x384] ss:$16 sps:$4 sm:$0xff]   ;;  %v6059_v21 = vld [vmem:[#allocation10 + $0x180] ss:$16 sps:$4 sm:$0xff]  }
 0x14b   :  { %1800 = vmatpush1.bf16.msra.mxu0 %v5975_v24  ;;  %v6062_v24 = vld [vmem:[#allocation10 + $0x380] ss:$16 sps:$4 sm:$0xff]  }
 0x14c   :  { %1841 = vmatpush1.bf16.msra.mxu1 %v5978_v25  ;;  %1801 = vmatprep.subr.bf16.mxu0 %v5983_v27  ;;  %v6067_v25 = vld [vmem:[#allocation10 + $0x1a4] ss:$16 sps:$4 sm:$0xff]  }
 0x14d   :  { %1842 = vmatprep.subr.bf16.mxu1 %v5986_v28  ;;  %v6070_v27 = vld [vmem:[#allocation10 + $0x3a4] ss:$16 sps:$4 sm:$0xff]   ;;  %v1854_v28 = vcombine.high %v7048_v16, %v7048_v16 }
 0x14f   :  { %1802 = vmatpush1.bf16.msra.mxu0 %v5981_v30  ;;  %v6068_v30 = vld [vmem:[#allocation10 + $0x3a0] ss:$16 sps:$4 sm:$0xff]  }
 0x150   :  { %1843 = vmatpush1.bf16.msra.mxu1 %v5984_v31  ;;  %3191 = vmatprep.subr.bf16.mxu0 %v5989_v32  ;;  %v6073_v31 = vld [vmem:[#allocation10 + $0x1c4] ss:$16 sps:$4 sm:$0xff]  }
 0x151   :  { %3232 = vmatprep.subr.bf16.mxu1 %v5992_v10  ;;  %v6076_v32 = vld [vmem:[#allocation10 + $0x3c4] ss:$16 sps:$4 sm:$0xff]   ;;  %v7070_v10 = vrot.slane %v1854_v28, %v7015_v49 }
 0x152   :  { %1804 = vmatmul.mubr.bf16.vlgmr.msra.gmra.mrb[8].mxu0 %v7032_v17  ;;  %v6007_v17 = vld [vmem:[#allocation10 + $0x64] ss:$16 sps:$4 sm:$0xff]  }
 0x153   :  { %1845 = vmatmul.mubr.bf16.vlgmr.msra.gmra.mrb[8].mxu1 %v7042_v26  ;;  %3192 = vmatpush1.bf16.msra.mxu0 %v5987_v34  ;;  %v6010_v26 = vld [vmem:[#allocation10 + $0x264] ss:$16 sps:$4 sm:$0xff]   ;;  %v6071_v34 = vld [vmem:[#allocation10 + $0x1c0] ss:$16 sps:$4 sm:$0xff]   ;;  %v1870_v16 = vcombine.high %v7070_v10, %v7070_v10 }
 0x154   :  { %3233 = vmatpush1.bf16.msra.mxu1 %v5990_v35  ;;  %3193 = vmatprep.subr.bf16.mxu0 %v5995_v36  ;;  %v6074_v35 = vld [vmem:[#allocation10 + $0x3c0] ss:$16 sps:$4 sm:$0xff]   ;;  %v6079_v36 = vld [vmem:[#allocation10 + $0x1e4] ss:$16 sps:$4 sm:$0xff]  }
 0x155   :  { %3234 = vmatprep.subr.bf16.mxu1 %v5998_v12  ;;  %3223 = vmatprep.mubr.bf16.mxu0 %v7057_v33  ;;  %v6082_v12 = vld [vmem:[#allocation10 + $0x3e4] ss:$16 sps:$4 sm:$0xff]  }
 0x156   :  { %3264 = vmatprep.mubr.bf16.mxu1 %v7061_v37  ;;  %v6136_v28 = vld [vmem:[#allocation10 + $0x704] ss:$16 sps:$4 sm:$0xff]  }
 0x157   :  { %3194 = vmatpush1.bf16.msra.mxu0 %v5993_v38  ;;  %v7076_v38 = vrot.slane %v7052_v23, %v7015_v49  ;;  %v6086_v23 = vld [vmem:[#allocation10 + $0x600] ss:$16 sps:$4 sm:$0xff]  }
 0x158   :  { %3235 = vmatpush1.bf16.msra.mxu1 %v5996_v39  ;;  %3195 = vmatprep.subr.bf16.mxu0 %v6001_v40  ;;  %v6077_v39 = vld [vmem:[#allocation10 + $0x1e0] ss:$16 sps:$4 sm:$0xff]  }
 0x159   :  { %3236 = vmatprep.subr.bf16.mxu1 %v6004_v41  ;;  %v6080_v40 = vld [vmem:[#allocation10 + $0x3e0] ss:$16 sps:$4 sm:$0xff]   ;;  %v6085_v41 = vld [vmem:[#allocation10 + $0x404] ss:$16 sps:$4 sm:$0xff]  }
 0x15b   :  { %3196 = vmatpush1.bf16.msra.mxu0 %v5999_v0  ;;  %v6088_v0 = vld [vmem:[#allocation10 + $0x604] ss:$16 sps:$4 sm:$0xff]  }
 0x15c   :  { %3237 = vmatpush1.bf16.msra.mxu1 %v6002_v22  ;;  %3197 = vmatprep.subr.bf16.mxu0 %v6007_v17  ;;  %v7079_v22 = vrot.slane %v1870_v16, %v7015_v49  ;;  %v7083_v17 = vcombine.high %v7076_v38, %v7076_v38  ;;  %v6143_v16 = vld [vmem:[#allocation10 + $0x540] ss:$16 sps:$4 sm:$0xff]  }
 0x15d   :  { %3238 = vmatprep.subr.bf16.mxu1 %v6010_v26  ;;  %v6083_v26 = vld [vmem:[#allocation10 + $0x400] ss:$16 sps:$4 sm:$0xff]  }
 0x15f   :  { %3198 = vmatpush1.bf16.msra.mxu0 %v6005_v42  ;;  %v6091_v42 = vld [vmem:[#allocation10 + $0x424] ss:$16 sps:$4 sm:$0xff]  }
 0x160   :  { %3239 = vmatpush1.bf16.msra.mxu1 %v6008_v44  ;;  %3199 = vmatprep.subr.bf16.mxu0 %v6013_v45  ;;  %v6094_v44 = vld [vmem:[#allocation10 + $0x624] ss:$16 sps:$4 sm:$0xff]   ;;  %v7087_v45 = vcombine.high %v7079_v22, %v7079_v22 }
 0x161   :  { %3240 = vmatprep.subr.bf16.mxu1 %v6016_v46  ;;  %v6089_v46 = vld [vmem:[#allocation10 + $0x420] ss:$16 sps:$4 sm:$0xff]  }
 0x163   :  { %3200 = vmatpush1.bf16.msra.mxu0 %v6011_v47  ;;  %v6092_v47 = vld [vmem:[#allocation10 + $0x620] ss:$16 sps:$4 sm:$0xff]  }
 0x164   :  { %3241 = vmatpush1.bf16.msra.mxu1 %v6014_v48  ;;  %3201 = vmatprep.subr.bf16.mxu0 %v6019_v50  ;;  %v6097_v48 = vld [vmem:[#allocation10 + $0x444] ss:$16 sps:$4 sm:$0xff]  }
 0x165   :  { %3242 = vmatprep.subr.bf16.mxu1 %v6022_v51  ;;  %v6100_v50 = vld [vmem:[#allocation10 + $0x644] ss:$16 sps:$4 sm:$0xff]   ;;  %v6095_v51 = vld [vmem:[#allocation10 + $0x440] ss:$16 sps:$4 sm:$0xff]  }
 0x167   :  { %3202 = vmatpush1.bf16.msra.mxu0 %v6017_v52  ;;  %v6098_v52 = vld [vmem:[#allocation10 + $0x640] ss:$16 sps:$4 sm:$0xff]  }
 0x168   :  { %3243 = vmatpush1.bf16.msra.mxu1 %v6020_v53  ;;  %3203 = vmatprep.subr.bf16.mxu0 %v6025_v54  ;;  %v6103_v53 = vld [vmem:[#allocation10 + $0x464] ss:$16 sps:$4 sm:$0xff]  }
 0x169   :  { %3244 = vmatprep.subr.bf16.mxu1 %v6028_v55  ;;  %v6106_v54 = vld [vmem:[#allocation10 + $0x664] ss:$16 sps:$4 sm:$0xff]   ;;  %v6101_v55 = vld [vmem:[#allocation10 + $0x460] ss:$16 sps:$4 sm:$0xff]  }
 0x16b   :  { %3204 = vmatpush1.bf16.msra.mxu0 %v6023_v56  ;;  %v6104_v56 = vld [vmem:[#allocation10 + $0x660] ss:$16 sps:$4 sm:$0xff]  }
 0x16c   :  { %3245 = vmatpush1.bf16.msra.mxu1 %v6026_v57  ;;  %3205 = vmatprep.subr.bf16.mxu0 %v6031_v58  ;;  %v6109_v57 = vld [vmem:[#allocation10 + $0x484] ss:$16 sps:$4 sm:$0xff]  }
 0x16d   :  { %3246 = vmatprep.subr.bf16.mxu1 %v6034_v59  ;;  %v6112_v58 = vld [vmem:[#allocation10 + $0x684] ss:$16 sps:$4 sm:$0xff]   ;;  %v6107_v59 = vld [vmem:[#allocation10 + $0x480] ss:$16 sps:$4 sm:$0xff]  }
 0x16f   :  { %3206 = vmatpush1.bf16.msra.mxu0 %v6029_v60  ;;  %v6110_v60 = vld [vmem:[#allocation10 + $0x680] ss:$16 sps:$4 sm:$0xff]  }
 0x170   :  { %3247 = vmatpush1.bf16.msra.mxu1 %v6032_v61  ;;  %3207 = vmatprep.subr.bf16.mxu0 %v6037_v62  ;;  %v6115_v61 = vld [vmem:[#allocation10 + $0x4a4] ss:$16 sps:$4 sm:$0xff]  }
 0x171   :  { %3248 = vmatprep.subr.bf16.mxu1 %v6040_v63  ;;  %v6118_v62 = vld [vmem:[#allocation10 + $0x6a4] ss:$16 sps:$4 sm:$0xff]   ;;  %v6113_v63 = vld [vmem:[#allocation10 + $0x4a0] ss:$16 sps:$4 sm:$0xff]  }
 0x173   :  { %3208 = vmatpush1.bf16.msra.mxu0 %v6035_v1  ;;  %v6116_v1 = vld [vmem:[#allocation10 + $0x6a0] ss:$16 sps:$4 sm:$0xff]  }
 0x174   :  { %3249 = vmatpush1.bf16.msra.mxu1 %v6038_v2  ;;  %3209 = vmatprep.subr.bf16.mxu0 %v6043_v3  ;;  %v6121_v2 = vld [vmem:[#allocation10 + $0x4c4] ss:$16 sps:$4 sm:$0xff]  }
 0x175   :  { %3250 = vmatprep.subr.bf16.mxu1 %v6046_v4  ;;  %v6124_v3 = vld [vmem:[#allocation10 + $0x6c4] ss:$16 sps:$4 sm:$0xff]  }
 0x177   :  { %3210 = vmatpush1.bf16.msra.mxu0 %v6041_v5 }
 0x178   :  { %3251 = vmatpush1.bf16.msra.mxu1 %v6044_v6  ;;  %3211 = vmatprep.subr.bf16.mxu0 %v6049_v7  ;;  %v6119_v6 = vld [vmem:[#allocation10 + $0x4c0] ss:$16 sps:$4 sm:$0xff]  }
 0x179   :  { %3252 = vmatprep.subr.bf16.mxu1 %v6052_v8  ;;  %v6122_v7 = vld [vmem:[#allocation10 + $0x6c0] ss:$16 sps:$4 sm:$0xff]  }
 0x17b   :  { %3212 = vmatpush1.bf16.msra.mxu0 %v6047_v9 }
 0x17c   :  { %3253 = vmatpush1.bf16.msra.mxu1 %v6050_v11  ;;  %3213 = vmatprep.subr.bf16.mxu0 %v6055_v13 }
 0x17d   :  { %3254 = vmatprep.subr.bf16.mxu1 %v6058_v14 }
 0x17f   :  { %3214 = vmatpush1.bf16.msra.mxu0 %v6053_v15 }
 0x180   :  { %3255 = vmatpush1.bf16.msra.mxu1 %v6056_v18  ;;  %3215 = vmatprep.subr.bf16.mxu0 %v6061_v19 }
 0x181   :  { %3256 = vmatprep.subr.bf16.mxu1 %v6064_v20  ;;  %v6127_v20 = vld [vmem:[#allocation10 + $0x4e4] ss:$16 sps:$4 sm:$0xff]  }
 0x183   :  { %3216 = vmatpush1.bf16.msra.mxu0 %v6059_v21  ;;  %v6130_v21 = vld [vmem:[#allocation10 + $0x6e4] ss:$16 sps:$4 sm:$0xff]  }
 0x184   :  { %3257 = vmatpush1.bf16.msra.mxu1 %v6062_v24  ;;  %3217 = vmatprep.subr.bf16.mxu0 %v6067_v25  ;;  %v6125_v24 = vld [vmem:[#allocation10 + $0x4e0] ss:$16 sps:$4 sm:$0xff]  }
 0x185   :  { %3258 = vmatprep.subr.bf16.mxu1 %v6070_v27  ;;  %v6128_v25 = vld [vmem:[#allocation10 + $0x6e0] ss:$16 sps:$4 sm:$0xff]   ;;  %v6133_v27 = vld [vmem:[#allocation10 + $0x504] ss:$16 sps:$4 sm:$0xff]  }
 0x187   :  { %3218 = vmatpush1.bf16.msra.mxu0 %v6065_v29  ;;  %v6131_v29 = vld [vmem:[#allocation10 + $0x500] ss:$16 sps:$4 sm:$0xff]  }
 0x188   :  { %3259 = vmatpush1.bf16.msra.mxu1 %v6068_v30  ;;  %3219 = vmatprep.subr.bf16.mxu0 %v6073_v31  ;;  %v6134_v30 = vld [vmem:[#allocation10 + $0x700] ss:$16 sps:$4 sm:$0xff]   ;;  %v6139_v31 = vld [vmem:[#allocation10 + $0x524] ss:$16 sps:$4 sm:$0xff]  }
 0x189   :  { %3260 = vmatprep.subr.bf16.mxu1 %v6076_v32  ;;  %v6142_v32 = vld [vmem:[#allocation10 + $0x724] ss:$16 sps:$4 sm:$0xff]  }
 0x18b   :  { %3220 = vmatpush1.bf16.msra.mxu0 %v6071_v34  ;;  %v6137_v34 = vld [vmem:[#allocation10 + $0x520] ss:$16 sps:$4 sm:$0xff]  }
 0x18c   :  { %3261 = vmatpush1.bf16.msra.mxu1 %v6074_v35  ;;  %3221 = vmatprep.subr.bf16.mxu0 %v6079_v36  ;;  %v6140_v35 = vld [vmem:[#allocation10 + $0x720] ss:$16 sps:$4 sm:$0xff]   ;;  %v6145_v36 = vld [vmem:[#allocation10 + $0x544] ss:$16 sps:$4 sm:$0xff]  }
 0x18d   :  { %3262 = vmatprep.subr.bf16.mxu1 %v6082_v12  ;;  %v6148_v12 = vld [vmem:[#allocation10 + $0x744] ss:$16 sps:$4 sm:$0xff]  }
 0x18f   :  { %3222 = vmatpush1.bf16.msra.mxu0 %v6077_v39  ;;  %v6146_v39 = vld [vmem:[#allocation10 + $0x740] ss:$16 sps:$4 sm:$0xff]  }
 0x190   :  { %3263 = vmatpush1.bf16.msra.mxu1 %v6080_v40  ;;  %3273 = vmatprep.subr.bf16.mxu0 %v6085_v41  ;;  %v6151_v40 = vld [vmem:[#allocation10 + $0x564] ss:$16 sps:$4 sm:$0xff]  }
 0x191   :  { %3314 = vmatprep.subr.bf16.mxu1 %v6088_v0  ;;  %v6154_v41 = vld [vmem:[#allocation10 + $0x764] ss:$16 sps:$4 sm:$0xff]   ;;  %v6149_v0 = vld [vmem:[#allocation10 + $0x560] ss:$16 sps:$4 sm:$0xff]  }
 0x192   :  { %3224 = vmatmul.mubr.bf16.vlgmr.msra.gmra.mrb[12].mxu0 %v7076_v38 }
 0x193   :  { %3265 = vmatmul.mubr.bf16.vlgmr.msra.gmra.mrb[12].mxu1 %v7083_v17  ;;  %3274 = vmatpush1.bf16.msra.mxu0 %v6083_v26  ;;  %v6152_v26 = vld [vmem:[#allocation10 + $0x760] ss:$16 sps:$4 sm:$0xff]  }
 0x194   :  { %3315 = vmatpush1.bf16.msra.mxu1 %v6086_v23  ;;  %3275 = vmatprep.subr.bf16.mxu0 %v6091_v42  ;;  %v6157_v23 = vld [vmem:[#allocation10 + $0x584] ss:$16 sps:$4 sm:$0xff]  }
 0x195   :  { %3316 = vmatprep.subr.bf16.mxu1 %v6094_v44  ;;  %3305 = vmatprep.mubr.bf16.mxu0 %v7079_v22  ;;  %v6160_v42 = vld [vmem:[#allocation10 + $0x784] ss:$16 sps:$4 sm:$0xff]   ;;  %v6155_v44 = vld [vmem:[#allocation10 + $0x580] ss:$16 sps:$4 sm:$0xff]  }
 0x196   :  { %3346 = vmatprep.mubr.bf16.mxu1 %v7087_v45 }
 0x197   :  { %3276 = vmatpush1.bf16.msra.mxu0 %v6089_v46  ;;  %v6158_v46 = vld [vmem:[#allocation10 + $0x780] ss:$16 sps:$4 sm:$0xff]  }
 0x198   :  { %3317 = vmatpush1.bf16.msra.mxu1 %v6092_v47  ;;  %3277 = vmatprep.subr.bf16.mxu0 %v6097_v48  ;;  %v6163_v47 = vld [vmem:[#allocation10 + $0x5a4] ss:$16 sps:$4 sm:$0xff]  }
 0x199   :  { %3318 = vmatprep.subr.bf16.mxu1 %v6100_v50  ;;  %v6166_v48 = vld [vmem:[#allocation10 + $0x7a4] ss:$16 sps:$4 sm:$0xff]   ;;  %v6161_v50 = vld [vmem:[#allocation10 + $0x5a0] ss:$16 sps:$4 sm:$0xff]  }
 0x19b   :  { %3278 = vmatpush1.bf16.msra.mxu0 %v6095_v51  ;;  %v6164_v51 = vld [vmem:[#allocation10 + $0x7a0] ss:$16 sps:$4 sm:$0xff]  }
 0x19c   :  { %3319 = vmatpush1.bf16.msra.mxu1 %v6098_v52  ;;  %3279 = vmatprep.subr.bf16.mxu0 %v6103_v53  ;;  %v6169_v52 = vld [vmem:[#allocation10 + $0x5c4] ss:$16 sps:$4 sm:$0xff]  }
 0x19d   :  { %3320 = vmatprep.subr.bf16.mxu1 %v6106_v54  ;;  %v6172_v53 = vld [vmem:[#allocation10 + $0x7c4] ss:$16 sps:$4 sm:$0xff]   ;;  %v6167_v54 = vld [vmem:[#allocation10 + $0x5c0] ss:$16 sps:$4 sm:$0xff]  }
 0x19f   :  { %3280 = vmatpush1.bf16.msra.mxu0 %v6101_v55  ;;  %v6170_v55 = vld [vmem:[#allocation10 + $0x7c0] ss:$16 sps:$4 sm:$0xff]  }
 0x1a0   :  { %3321 = vmatpush1.bf16.msra.mxu1 %v6104_v56  ;;  %3281 = vmatprep.subr.bf16.mxu0 %v6109_v57  ;;  %v6175_v56 = vld [vmem:[#allocation10 + $0x5e4] ss:$16 sps:$4 sm:$0xff]  }
 0x1a1   :  { %3322 = vmatprep.subr.bf16.mxu1 %v6112_v58  ;;  %v6178_v57 = vld [vmem:[#allocation10 + $0x7e4] ss:$16 sps:$4 sm:$0xff]   ;;  %v7099_v58 = vrot.slane %v7070_v10, %v7015_v49  ;;  %v6186_v10 = vld [vmem:[#allocation10 + $0x28] ss:$16 sps:$4 sm:$0xff]  }
 0x1a3   :  { %3282 = vmatpush1.bf16.msra.mxu0 %v6107_v59  ;;  %v6173_v59 = vld [vmem:[#allocation10 + $0x5e0] ss:$16 sps:$4 sm:$0xff]  }
 0x1a4   :  { %3323 = vmatpush1.bf16.msra.mxu1 %v6110_v60  ;;  %3283 = vmatprep.subr.bf16.mxu0 %v6115_v61  ;;  %v6176_v60 = vld [vmem:[#allocation10 + $0x7e0] ss:$16 sps:$4 sm:$0xff]   ;;  %v6182_v61 = vld [vmem:[#allocation10 + $0xc] ss:$16 sps:$4 sm:$0xff]  }
 0x1a5   :  { %3324 = vmatprep.subr.bf16.mxu1 %v6118_v62  ;;  %v1641_v4 = vpop.f32.mrb[0].mxu0  ;;  %v6185_v62 = vld [vmem:[#allocation10 + $0x20c] ss:$16 sps:$4 sm:$0xff]  }
 0x1a6   :  { %v1682_v5 = vpop.f32.mrb[0].mxu1  ;;  %v1643_v9 = vpop.f32.mrb[1].mxu0 }
 0x1a7   :  { %v7093_v8 = vadd.f32 %v1682_v5, %v1641_v4  ;;  %v1684_v11 = vpop.f32.mrb[1].mxu1  ;;  %v1645_v14 = vpop.f32.mrb[2].mxu0  ;;  %3284 = vmatpush1.bf16.msra.mxu0 %v6113_v63  ;;  %v6180_v63 = vld [vmem:[#allocation10 + $0x8] ss:$16 sps:$4 sm:$0xff]   ;;  %v6191_v4 = vld [vmem:[#allocation10 + $0x22c] ss:$16 sps:$4 sm:$0xff]  }
 0x1a8   :  { %v7095_v13 = vadd.f32 %v1684_v11, %v1643_v9  ;;  %v1686_v15 = vpop.f32.mrb[2].mxu1  ;;  %3325 = vmatpush1.bf16.msra.mxu1 %v6116_v1  ;;  %v1646_v18 = vpop.f32.mrb[3].mxu0  ;;  %3285 = vmatprep.subr.bf16.mxu0 %v6121_v2  ;;  %v6183_v1 = vld [vmem:[#allocation10 + $0x208] ss:$16 sps:$4 sm:$0xff]   ;;  %v7103_v2 = vcombine.high %v7099_v58, %v7099_v58  ;;  %v6200_v14 = vld [vmem:[#allocation10 + $0x6c] ss:$16 sps:$4 sm:$0xff]  }
 0x1a9   :  { %v1687_v19 = vpop.f32.mrb[3].mxu1  ;;  %3326 = vmatprep.subr.bf16.mxu1 %v6124_v3  ;;  %v6188_v3 = vld [vmem:[#allocation10 + $0x2c] ss:$16 sps:$4 sm:$0xff]   ;;  %v6189_v5 = vld [vmem:[#allocation10 + $0x228] ss:$16 sps:$4 sm:$0xff]  }
 0x1aa   :  { %v6192_v9 = vld [vmem:[#allocation10 + $0x48] ss:$16 sps:$4 sm:$0xff]   ;;  %v6203_v15 = vld [vmem:[#allocation10 + $0x26c] ss:$16 sps:$4 sm:$0xff]  }
 0x1ab   :  { %3286 = vmatpush1.bf16.msra.mxu0 %v6119_v6  ;;  %v6194_v6 = vld [vmem:[#allocation10 + $0x4c] ss:$16 sps:$4 sm:$0xff]   ;;  %v6195_v11 = vld [vmem:[#allocation10 + $0x248] ss:$16 sps:$4 sm:$0xff]  }
 0x1ac   :  { %3327 = vmatpush1.bf16.msra.mxu1 %v6122_v7  ;;  %3287 = vmatprep.subr.bf16.mxu0 %v6127_v20  ;;  %v6197_v7 = vld [vmem:[#allocation10 + $0x24c] ss:$16 sps:$4 sm:$0xff]   ;;  %v6198_v18 = vld [vmem:[#allocation10 + $0x68] ss:$16 sps:$4 sm:$0xff]  }
 0x1ad   :  { %3328 = vmatprep.subr.bf16.mxu1 %v6130_v21  ;;  %v6201_v19 = vld [vmem:[#allocation10 + $0x268] ss:$16 sps:$4 sm:$0xff]   ;;  %v6206_v20 = vld [vmem:[#allocation10 + $0x8c] ss:$16 sps:$4 sm:$0xff]  }
 0x1ae   :  { %v6209_v21 = vld [vmem:[#allocation10 + $0x28c] ss:$16 sps:$4 sm:$0xff]  }
 0x1af   :  { %3288 = vmatpush1.bf16.msra.mxu0 %v6125_v24  ;;  %v6204_v24 = vld [vmem:[#allocation10 + $0x88] ss:$16 sps:$4 sm:$0xff]  }
 0x1b0   :  { %3329 = vmatpush1.bf16.msra.mxu1 %v6128_v25  ;;  %3289 = vmatprep.subr.bf16.mxu0 %v6133_v27  ;;  %v6207_v25 = vld [vmem:[#allocation10 + $0x288] ss:$16 sps:$4 sm:$0xff]   ;;  %v6212_v27 = vld [vmem:[#allocation10 + $0xac] ss:$16 sps:$4 sm:$0xff]  }
 0x1b1   :  { %3330 = vmatprep.subr.bf16.mxu1 %v6136_v28  ;;  %v6213_v28 = vld [vmem:[#allocation10 + $0x2a8] ss:$16 sps:$4 sm:$0xff]  }
 0x1b3   :  { %3290 = vmatpush1.bf16.msra.mxu0 %v6131_v29  ;;  %v6218_v29 = vld [vmem:[#allocation10 + $0xcc] ss:$16 sps:$4 sm:$0xff]  }
 0x1b4   :  { %3331 = vmatpush1.bf16.msra.mxu1 %v6134_v30  ;;  %3291 = vmatprep.subr.bf16.mxu0 %v6139_v31  ;;  %v6221_v30 = vld [vmem:[#allocation10 + $0x2cc] ss:$16 sps:$4 sm:$0xff]  }
 0x1b5   :  { %3332 = vmatprep.subr.bf16.mxu1 %v6142_v32 }
 0x1b7   :  { %3292 = vmatpush1.bf16.msra.mxu0 %v6137_v34  ;;  %v6216_v34 = vld [vmem:[#allocation10 + $0xc8] ss:$16 sps:$4 sm:$0xff]  }
 0x1b8   :  { %3333 = vmatpush1.bf16.msra.mxu1 %v6140_v35  ;;  %3293 = vmatprep.subr.bf16.mxu0 %v6145_v36  ;;  %v6219_v35 = vld [vmem:[#allocation10 + $0x2c8] ss:$16 sps:$4 sm:$0xff]  }
 0x1b9   :  { %3334 = vmatprep.subr.bf16.mxu1 %v6148_v12 }
 0x1bb   :  { %3294 = vmatpush1.bf16.msra.mxu0 %v6143_v16 }
 0x1bc   :  { %3335 = vmatpush1.bf16.msra.mxu1 %v6146_v39  ;;  %3295 = vmatprep.subr.bf16.mxu0 %v6151_v40  ;;  %v6224_v39 = vld [vmem:[#allocation10 + $0xec] ss:$16 sps:$4 sm:$0xff]  }
 0x1bd   :  { %3336 = vmatprep.subr.bf16.mxu1 %v6154_v41  ;;  %v6227_v40 = vld [vmem:[#allocation10 + $0x2ec] ss:$16 sps:$4 sm:$0xff]  }
 0x1bf   :  { %3296 = vmatpush1.bf16.msra.mxu0 %v6149_v0 }
 0x1c0   :  { %3337 = vmatpush1.bf16.msra.mxu1 %v6152_v26  ;;  %3297 = vmatprep.subr.bf16.mxu0 %v6157_v23 }
 0x1c1   :  { %3338 = vmatprep.subr.bf16.mxu1 %v6160_v42 }
 0x1c3   :  { %3298 = vmatpush1.bf16.msra.mxu0 %v6155_v44  ;;  %v6222_v44 = vld [vmem:[#allocation10 + $0xe8] ss:$16 sps:$4 sm:$0xff]  }
 0x1c4   :  { %3339 = vmatpush1.bf16.msra.mxu1 %v6158_v46  ;;  %3299 = vmatprep.subr.bf16.mxu0 %v6163_v47  ;;  %v6225_v46 = vld [vmem:[#allocation10 + $0x2e8] ss:$16 sps:$4 sm:$0xff]   ;;  %v6233_v47 = vld [vmem:[#allocation10 + $0x30c] ss:$16 sps:$4 sm:$0xff]  }
 0x1c5   :  { %3340 = vmatprep.subr.bf16.mxu1 %v6166_v48  ;;  %v6228_v48 = vld [vmem:[#allocation10 + $0x108] ss:$16 sps:$4 sm:$0xff]  }
 0x1c7   :  { %3300 = vmatpush1.bf16.msra.mxu0 %v6161_v50  ;;  %v6231_v50 = vld [vmem:[#allocation10 + $0x308] ss:$16 sps:$4 sm:$0xff]  }
 0x1c8   :  { %3341 = vmatpush1.bf16.msra.mxu1 %v6164_v51  ;;  %3301 = vmatprep.subr.bf16.mxu0 %v6169_v52  ;;  %v6239_v51 = vld [vmem:[#allocation10 + $0x32c] ss:$16 sps:$4 sm:$0xff]   ;;  %v6234_v52 = vld [vmem:[#allocation10 + $0x128] ss:$16 sps:$4 sm:$0xff]  }
 0x1c9   :  { %3342 = vmatprep.subr.bf16.mxu1 %v6172_v53  ;;  %v6237_v53 = vld [vmem:[#allocation10 + $0x328] ss:$16 sps:$4 sm:$0xff]  }
 0x1cb   :  { %3302 = vmatpush1.bf16.msra.mxu0 %v6167_v54  ;;  %v6242_v54 = vld [vmem:[#allocation10 + $0x14c] ss:$16 sps:$4 sm:$0xff]  }
 0x1cc   :  { %3343 = vmatpush1.bf16.msra.mxu1 %v6170_v55  ;;  %3303 = vmatprep.subr.bf16.mxu0 %v6175_v56  ;;  %v6245_v55 = vld [vmem:[#allocation10 + $0x34c] ss:$16 sps:$4 sm:$0xff]   ;;  %v6240_v56 = vld [vmem:[#allocation10 + $0x148] ss:$16 sps:$4 sm:$0xff]  }
 0x1cd   :  { %3344 = vmatprep.subr.bf16.mxu1 %v6178_v57  ;;  %v6243_v57 = vld [vmem:[#allocation10 + $0x348] ss:$16 sps:$4 sm:$0xff]  }
 0x1cf   :  { %3304 = vmatpush1.bf16.msra.mxu0 %v6173_v59  ;;  %v6248_v59 = vld [vmem:[#allocation10 + $0x16c] ss:$16 sps:$4 sm:$0xff]  }
 0x1d0   :  { %3345 = vmatpush1.bf16.msra.mxu1 %v6176_v60  ;;  %3355 = vmatprep.subr.bf16.mxu0 %v6182_v61  ;;  %v6251_v60 = vld [vmem:[#allocation10 + $0x36c] ss:$16 sps:$4 sm:$0xff]   ;;  %v6246_v61 = vld [vmem:[#allocation10 + $0x168] ss:$16 sps:$4 sm:$0xff]  }
 0x1d1   :  { %3396 = vmatprep.subr.bf16.mxu1 %v6185_v62  ;;  %v6249_v62 = vld [vmem:[#allocation10 + $0x368] ss:$16 sps:$4 sm:$0xff]  }
 0x1d2   :  { %3306 = vmatmul.mubr.bf16.vlgmr.msra.gmra.mrb[16].mxu0 %v7099_v58 }
 0x1d3   :  { %3347 = vmatmul.mubr.bf16.vlgmr.msra.gmra.mrb[16].mxu1 %v7103_v2  ;;  %3356 = vmatpush1.bf16.msra.mxu0 %v6180_v63  ;;  %v6254_v63 = vld [vmem:[#allocation10 + $0x18c] ss:$16 sps:$4 sm:$0xff]  }
 0x1d4   :  { %3397 = vmatpush1.bf16.msra.mxu1 %v6183_v1  ;;  %3357 = vmatprep.subr.bf16.mxu0 %v6188_v3  ;;  %v6257_v1 = vld [vmem:[#allocation10 + $0x38c] ss:$16 sps:$4 sm:$0xff]   ;;  %v6252_v3 = vld [vmem:[#allocation10 + $0x188] ss:$16 sps:$4 sm:$0xff]  }
 0x1d5   :  { %3398 = vmatprep.subr.bf16.mxu1 %v6191_v4  ;;  %3387 = vmatprep.mubr.bf16.mxu0 %v7057_v33  ;;  %v6215_v33 = vld [vmem:[#allocation10 + $0x2ac] ss:$16 sps:$4 sm:$0xff]   ;;  %v6255_v4 = vld [vmem:[#allocation10 + $0x388] ss:$16 sps:$4 sm:$0xff]  }
 0x1d6   :  { %3428 = vmatprep.mubr.bf16.mxu1 %v7061_v37  ;;  %v6210_v37 = vld [vmem:[#allocation10 + $0xa8] ss:$16 sps:$4 sm:$0xff]  }
 0x1d7   :  { %3358 = vmatpush1.bf16.msra.mxu0 %v6186_v10  ;;  %v6260_v10 = vld [vmem:[#allocation10 + $0x1ac] ss:$16 sps:$4 sm:$0xff]  }
 0x1d8   :  { %3399 = vmatpush1.bf16.msra.mxu1 %v6189_v5  ;;  %3359 = vmatprep.subr.bf16.mxu0 %v6194_v6  ;;  %v6263_v5 = vld [vmem:[#allocation10 + $0x3ac] ss:$16 sps:$4 sm:$0xff]   ;;  %v6258_v6 = vld [vmem:[#allocation10 + $0x1a8] ss:$16 sps:$4 sm:$0xff]  }
 0x1d9   :  { %3400 = vmatprep.subr.bf16.mxu1 %v6197_v7  ;;  %v6261_v7 = vld [vmem:[#allocation10 + $0x3a8] ss:$16 sps:$4 sm:$0xff]  }
 0x1db   :  { %3360 = vmatpush1.bf16.msra.mxu0 %v6192_v9  ;;  %v6266_v9 = vld [vmem:[#allocation10 + $0x1cc] ss:$16 sps:$4 sm:$0xff]  }
 0x1dc   :  { %3401 = vmatpush1.bf16.msra.mxu1 %v6195_v11  ;;  %3361 = vmatprep.subr.bf16.mxu0 %v6200_v14  ;;  %v6269_v11 = vld [vmem:[#allocation10 + $0x3cc] ss:$16 sps:$4 sm:$0xff]   ;;  %v6264_v14 = vld [vmem:[#allocation10 + $0x1c8] ss:$16 sps:$4 sm:$0xff]  }
 0x1dd   :  { %3402 = vmatprep.subr.bf16.mxu1 %v6203_v15  ;;  %v6267_v15 = vld [vmem:[#allocation10 + $0x3c8] ss:$16 sps:$4 sm:$0xff]  }
 0x1df   :  { %3362 = vmatpush1.bf16.msra.mxu0 %v6198_v18  ;;  %v6272_v18 = vld [vmem:[#allocation10 + $0x1ec] ss:$16 sps:$4 sm:$0xff]  }
 0x1e0   :  { %3403 = vmatpush1.bf16.msra.mxu1 %v6201_v19  ;;  %3363 = vmatprep.subr.bf16.mxu0 %v6206_v20  ;;  %v6275_v19 = vld [vmem:[#allocation10 + $0x3ec] ss:$16 sps:$4 sm:$0xff]   ;;  %v6270_v20 = vld [vmem:[#allocation10 + $0x1e8] ss:$16 sps:$4 sm:$0xff]  }
 0x1e1   :  { %3404 = vmatprep.subr.bf16.mxu1 %v6209_v21  ;;  %v6273_v21 = vld [vmem:[#allocation10 + $0x3e8] ss:$16 sps:$4 sm:$0xff]  }
 0x1e3   :  { %3364 = vmatpush1.bf16.msra.mxu0 %v6204_v24  ;;  %v6278_v24 = vld [vmem:[#allocation10 + $0x40c] ss:$16 sps:$4 sm:$0xff]  }
 0x1e4   :  { %3405 = vmatpush1.bf16.msra.mxu1 %v6207_v25  ;;  %3365 = vmatprep.subr.bf16.mxu0 %v6212_v27  ;;  %v6281_v25 = vld [vmem:[#allocation10 + $0x60c] ss:$16 sps:$4 sm:$0xff]   ;;  %v6276_v27 = vld [vmem:[#allocation10 + $0x408] ss:$16 sps:$4 sm:$0xff]  }
 0x1e5   :  { %3406 = vmatprep.subr.bf16.mxu1 %v6215_v33  ;;  %v1723_v31 = vpop.f32.mrb[4].mxu0  ;;  %v6279_v33 = vld [vmem:[#allocation10 + $0x608] ss:$16 sps:$4 sm:$0xff]  }
 0x1e6   :  { %v7109_v32 = vpop.f32.mrb[4].mxu1  ;;  %v7112_v36 = vadd.f32 %v1723_v31, %v7093_v8  ;;  %v1725_v12 = vpop.f32.mrb[5].mxu0  ;;  %v6230_v8 = vld [vmem:[#allocation10 + $0x10c] ss:$16 sps:$4 sm:$0xff]  }
 0x1e7   :  { %v7114_v16 = vpop.f32.mrb[5].mxu1  ;;  %v7117_v41 = vadd.f32 %v1725_v12, %v7095_v13  ;;  %v1727_v0 = vpop.f32.mrb[6].mxu0  ;;  %3366 = vmatpush1.bf16.msra.mxu0 %v6210_v37  ;;  %v6236_v13 = vld [vmem:[#allocation10 + $0x12c] ss:$16 sps:$4 sm:$0xff]   ;;  %v6291_v12 = vld [vmem:[#allocation10 + $0x648] ss:$16 sps:$4 sm:$0xff]  }
 0x1e8   :  { %v1768_v26 = vpop.f32.mrb[6].mxu1  ;;  %3407 = vmatpush1.bf16.msra.mxu1 %v6213_v28  ;;  %v1728_v23 = vpop.f32.mrb[7].mxu0  ;;  %3367 = vmatprep.subr.bf16.mxu0 %v6218_v29  ;;  %v6284_v37 = vld [vmem:[#allocation10 + $0x42c] ss:$16 sps:$4 sm:$0xff]   ;;  %v6282_v29 = vld [vmem:[#allocation10 + $0x428] ss:$16 sps:$4 sm:$0xff]  }
 0x1e9   :  { %v1769_v42 = vpop.f32.mrb[7].mxu1  ;;  %3408 = vmatprep.subr.bf16.mxu1 %v6221_v30  ;;  %v6287_v28 = vld [vmem:[#allocation10 + $0x62c] ss:$16 sps:$4 sm:$0xff]   ;;  %v6285_v30 = vld [vmem:[#allocation10 + $0x628] ss:$16 sps:$4 sm:$0xff]  }
 0x1ea   :  { %v6290_v31 = vld [vmem:[#allocation10 + $0x44c] ss:$16 sps:$4 sm:$0xff]  }
 0x1eb   :  { %3368 = vmatpush1.bf16.msra.mxu0 %v6216_v34  ;;  %v6293_v34 = vld [vmem:[#allocation10 + $0x64c] ss:$16 sps:$4 sm:$0xff]  }
 0x1ec   :  { %3409 = vmatpush1.bf16.msra.mxu1 %v6219_v35  ;;  %3369 = vmatprep.subr.bf16.mxu0 %v6224_v39  ;;  %v6288_v35 = vld [vmem:[#allocation10 + $0x448] ss:$16 sps:$4 sm:$0xff]   ;;  %v6302_v0 = vld [vmem:[#allocation10 + $0x48c] ss:$16 sps:$4 sm:$0xff]  }
 0x1ed   :  { %3410 = vmatprep.subr.bf16.mxu1 %v6227_v40  ;;  %v6294_v39 = vld [vmem:[#allocation10 + $0x468] ss:$16 sps:$4 sm:$0xff]   ;;  %v6305_v26 = vld [vmem:[#allocation10 + $0x68c] ss:$16 sps:$4 sm:$0xff]  }
 0x1ee   :  { %v6297_v40 = vld [vmem:[#allocation10 + $0x668] ss:$16 sps:$4 sm:$0xff]   ;;  %v6308_v23 = vld [vmem:[#allocation10 + $0x4ac] ss:$16 sps:$4 sm:$0xff]  }
 0x1ef   :  { %3370 = vmatpush1.bf16.msra.mxu0 %v6222_v44  ;;  %v6311_v42 = vld [vmem:[#allocation10 + $0x6ac] ss:$16 sps:$4 sm:$0xff]   ;;  %v6306_v44 = vld [vmem:[#allocation10 + $0x4a8] ss:$16 sps:$4 sm:$0xff]  }
 0x1f0   :  { %3411 = vmatpush1.bf16.msra.mxu1 %v6225_v46  ;;  %3371 = vmatprep.subr.bf16.mxu0 %v6230_v8  ;;  %v6309_v46 = vld [vmem:[#allocation10 + $0x6a8] ss:$16 sps:$4 sm:$0xff]   ;;  %v6314_v8 = vld [vmem:[#allocation10 + $0x4cc] ss:$16 sps:$4 sm:$0xff]  }
 0x1f1   :  { %3412 = vmatprep.subr.bf16.mxu1 %v6233_v47  ;;  %v6317_v47 = vld [vmem:[#allocation10 + $0x6cc] ss:$16 sps:$4 sm:$0xff]  }
 0x1f3   :  { %3372 = vmatpush1.bf16.msra.mxu0 %v6228_v48 }
 0x1f4   :  { %3413 = vmatpush1.bf16.msra.mxu1 %v6231_v50  ;;  %3373 = vmatprep.subr.bf16.mxu0 %v6236_v13 }
 0x1f5   :  { %3414 = vmatprep.subr.bf16.mxu1 %v6239_v51 }
 0x1f7   :  { %3374 = vmatpush1.bf16.msra.mxu0 %v6234_v52 }
 0x1f8   :  { %3415 = vmatpush1.bf16.msra.mxu1 %v6237_v53  ;;  %3375 = vmatprep.subr.bf16.mxu0 %v6242_v54 }
 0x1f9   :  { %3416 = vmatprep.subr.bf16.mxu1 %v6245_v55 }
 0x1fb   :  { %3376 = vmatpush1.bf16.msra.mxu0 %v6240_v56  ;;  %v6312_v56 = vld [vmem:[#allocation10 + $0x4c8] ss:$16 sps:$4 sm:$0xff]  }
 0x1fc   :  { %3417 = vmatpush1.bf16.msra.mxu1 %v6243_v57  ;;  %3377 = vmatprep.subr.bf16.mxu0 %v6248_v59  ;;  %v6315_v57 = vld [vmem:[#allocation10 + $0x6c8] ss:$16 sps:$4 sm:$0xff]  }
 0x1fd   :  { %3418 = vmatprep.subr.bf16.mxu1 %v6251_v60 }
 0x1ff   :  { %3378 = vmatpush1.bf16.msra.mxu0 %v6246_v61 }
 0x200   :  { %3419 = vmatpush1.bf16.msra.mxu1 %v6249_v62  ;;  %3379 = vmatprep.subr.bf16.mxu0 %v6254_v63  ;;  %v6320_v62 = vld [vmem:[#allocation10 + $0x4ec] ss:$16 sps:$4 sm:$0xff]  }
 0x201   :  { %3420 = vmatprep.subr.bf16.mxu1 %v6257_v1  ;;  %v6323_v63 = vld [vmem:[#allocation10 + $0x6ec] ss:$16 sps:$4 sm:$0xff]  }
 0x203   :  { %3380 = vmatpush1.bf16.msra.mxu0 %v6252_v3  ;;  %v6326_v3 = vld [vmem:[#allocation10 + $0x50c] ss:$16 sps:$4 sm:$0xff]  }
 0x204   :  { %3421 = vmatpush1.bf16.msra.mxu1 %v6255_v4  ;;  %3381 = vmatprep.subr.bf16.mxu0 %v6260_v10  ;;  %v6329_v4 = vld [vmem:[#allocation10 + $0x70c] ss:$16 sps:$4 sm:$0xff]   ;;  %v6324_v10 = vld [vmem:[#allocation10 + $0x508] ss:$16 sps:$4 sm:$0xff]  }
 0x205   :  { %3422 = vmatprep.subr.bf16.mxu1 %v6263_v5  ;;  %v6327_v5 = vld [vmem:[#allocation10 + $0x708] ss:$16 sps:$4 sm:$0xff]  }
 0x207   :  { %3382 = vmatpush1.bf16.msra.mxu0 %v6258_v6  ;;  %v6332_v6 = vld [vmem:[#allocation10 + $0x52c] ss:$16 sps:$4 sm:$0xff]  }
 0x208   :  { %3423 = vmatpush1.bf16.msra.mxu1 %v6261_v7  ;;  %3383 = vmatprep.subr.bf16.mxu0 %v6266_v9  ;;  %v6335_v7 = vld [vmem:[#allocation10 + $0x72c] ss:$16 sps:$4 sm:$0xff]   ;;  %v6330_v9 = vld [vmem:[#allocation10 + $0x528] ss:$16 sps:$4 sm:$0xff]  }
 0x209   :  { %3424 = vmatprep.subr.bf16.mxu1 %v6269_v11  ;;  %v6333_v11 = vld [vmem:[#allocation10 + $0x728] ss:$16 sps:$4 sm:$0xff]  }
 0x20b   :  { %3384 = vmatpush1.bf16.msra.mxu0 %v6264_v14  ;;  %v6338_v14 = vld [vmem:[#allocation10 + $0x54c] ss:$16 sps:$4 sm:$0xff]  }
 0x20c   :  { %3425 = vmatpush1.bf16.msra.mxu1 %v6267_v15  ;;  %3385 = vmatprep.subr.bf16.mxu0 %v6272_v18  ;;  %v6341_v15 = vld [vmem:[#allocation10 + $0x74c] ss:$16 sps:$4 sm:$0xff]   ;;  %v6336_v18 = vld [vmem:[#allocation10 + $0x548] ss:$16 sps:$4 sm:$0xff]  }
 0x20d   :  { %3426 = vmatprep.subr.bf16.mxu1 %v6275_v19  ;;  %v6339_v19 = vld [vmem:[#allocation10 + $0x748] ss:$16 sps:$4 sm:$0xff]  }
 0x20f   :  { %3386 = vmatpush1.bf16.msra.mxu0 %v6270_v20  ;;  %v6344_v20 = vld [vmem:[#allocation10 + $0x56c] ss:$16 sps:$4 sm:$0xff]  }
 0x210   :  { %3427 = vmatpush1.bf16.msra.mxu1 %v6273_v21  ;;  %3437 = vmatprep.subr.bf16.mxu0 %v6278_v24  ;;  %v6347_v21 = vld [vmem:[#allocation10 + $0x76c] ss:$16 sps:$4 sm:$0xff]   ;;  %v6342_v24 = vld [vmem:[#allocation10 + $0x568] ss:$16 sps:$4 sm:$0xff]  }
 0x211   :  { %3478 = vmatprep.subr.bf16.mxu1 %v6281_v25  ;;  %v6345_v25 = vld [vmem:[#allocation10 + $0x768] ss:$16 sps:$4 sm:$0xff]  }
 0x212   :  { %3388 = vmatmul.mubr.bf16.vlgmr.msra.gmra.mrb[20].mxu0 %v7076_v38  ;;  %v6296_v38 = vld [vmem:[#allocation10 + $0x46c] ss:$16 sps:$4 sm:$0xff]  }
 0x213   :  { %3429 = vmatmul.mubr.bf16.vlgmr.msra.gmra.mrb[20].mxu1 %v7083_v17  ;;  %3438 = vmatpush1.bf16.msra.mxu0 %v6276_v27  ;;  %v6299_v17 = vld [vmem:[#allocation10 + $0x66c] ss:$16 sps:$4 sm:$0xff]  }
 0x214   :  { %3479 = vmatpush1.bf16.msra.mxu1 %v6279_v33  ;;  %3439 = vmatprep.subr.bf16.mxu0 %v6284_v37  ;;  %v6350_v27 = vld [vmem:[#allocation10 + $0x58c] ss:$16 sps:$4 sm:$0xff]   ;;  %v6348_v37 = vld [vmem:[#allocation10 + $0x588] ss:$16 sps:$4 sm:$0xff]  }
 0x215   :  { %3480 = vmatprep.subr.bf16.mxu1 %v6287_v28  ;;  %3469 = vmatprep.mubr.bf16.mxu0 %v7079_v22  ;;  %v6300_v22 = vld [vmem:[#allocation10 + $0x488] ss:$16 sps:$4 sm:$0xff]   ;;  %v6353_v33 = vld [vmem:[#allocation10 + $0x78c] ss:$16 sps:$4 sm:$0xff]  }
 0x216   :  { %3510 = vmatprep.mubr.bf16.mxu1 %v7087_v45  ;;  %v6303_v45 = vld [vmem:[#allocation10 + $0x688] ss:$16 sps:$4 sm:$0xff]  }
 0x217   :  { %3440 = vmatpush1.bf16.msra.mxu0 %v6282_v29  ;;  %v6351_v28 = vld [vmem:[#allocation10 + $0x788] ss:$16 sps:$4 sm:$0xff]   ;;  %v6356_v29 = vld [vmem:[#allocation10 + $0x5ac] ss:$16 sps:$4 sm:$0xff]  }
 0x218   :  { %3481 = vmatpush1.bf16.msra.mxu1 %v6285_v30  ;;  %3441 = vmatprep.subr.bf16.mxu0 %v6290_v31  ;;  %v6359_v30 = vld [vmem:[#allocation10 + $0x7ac] ss:$16 sps:$4 sm:$0xff]   ;;  %v6354_v31 = vld [vmem:[#allocation10 + $0x5a8] ss:$16 sps:$4 sm:$0xff]  }
 0x219   :  { %3482 = vmatprep.subr.bf16.mxu1 %v6293_v34  ;;  %v6357_v34 = vld [vmem:[#allocation10 + $0x7a8] ss:$16 sps:$4 sm:$0xff]  }
 0x21b   :  { %3442 = vmatpush1.bf16.msra.mxu0 %v6288_v35  ;;  %v6362_v35 = vld [vmem:[#allocation10 + $0x5cc] ss:$16 sps:$4 sm:$0xff]  }
 0x21c   :  { %3483 = vmatpush1.bf16.msra.mxu1 %v6291_v12  ;;  %3443 = vmatprep.subr.bf16.mxu0 %v6296_v38  ;;  %v6365_v12 = vld [vmem:[#allocation10 + $0x7cc] ss:$16 sps:$4 sm:$0xff]   ;;  %v6360_v38 = vld [vmem:[#allocation10 + $0x5c8] ss:$16 sps:$4 sm:$0xff]  }
 0x21d   :  { %3484 = vmatprep.subr.bf16.mxu1 %v6299_v17  ;;  %v6363_v17 = vld [vmem:[#allocation10 + $0x7c8] ss:$16 sps:$4 sm:$0xff]  }
 0x21f   :  { %3444 = vmatpush1.bf16.msra.mxu0 %v6294_v39  ;;  %v6368_v39 = vld [vmem:[#allocation10 + $0x5ec] ss:$16 sps:$4 sm:$0xff]  }
 0x220   :  { %3485 = vmatpush1.bf16.msra.mxu1 %v6297_v40  ;;  %3445 = vmatprep.subr.bf16.mxu0 %v6302_v0  ;;  %v6371_v40 = vld [vmem:[#allocation10 + $0x7ec] ss:$16 sps:$4 sm:$0xff]   ;;  %v6366_v0 = vld [vmem:[#allocation10 + $0x5e8] ss:$16 sps:$4 sm:$0xff]  }
 0x221   :  { %3486 = vmatprep.subr.bf16.mxu1 %v6305_v26  ;;  %v6369_v26 = vld [vmem:[#allocation10 + $0x7e8] ss:$16 sps:$4 sm:$0xff]  }
 0x223   :  { %3446 = vmatpush1.bf16.msra.mxu0 %v6300_v22 }
 0x224   :  { %3487 = vmatpush1.bf16.msra.mxu1 %v6303_v45  ;;  %3447 = vmatprep.subr.bf16.mxu0 %v6308_v23 }
 0x225   :  { %3488 = vmatprep.subr.bf16.mxu1 %v6311_v42  ;;  %v1805_v48 = vpop.f32.mrb[8].mxu0 }
 0x226   :  { %v1846_v50 = vpop.f32.mrb[8].mxu1  ;;  %v1806_v13 = vadd.f32 %v1805_v48, %v7109_v32  ;;  %v1807_v51 = vpop.f32.mrb[9].mxu0  ;;  %v6318_v32 = vld [vmem:[#allocation10 + $0x4e8] ss:$16 sps:$4 sm:$0xff]  }
 0x227   :  { %v1848_v52 = vpop.f32.mrb[9].mxu1  ;;  %v1808_v53 = vadd.f32 %v1807_v51, %v7114_v16  ;;  %v1809_v54 = vpop.f32.mrb[10].mxu0  ;;  %3448 = vmatpush1.bf16.msra.mxu0 %v6306_v44  ;;  %v6321_v16 = vld [vmem:[#allocation10 + $0x6e8] ss:$16 sps:$4 sm:$0xff]  }
 0x228   :  { %v1850_v55 = vpop.f32.mrb[10].mxu1  ;;  %3489 = vmatpush1.bf16.msra.mxu1 %v6309_v46  ;;  %v7125_v59 = vadd.f32 %v1846_v50, %v1806_v13  ;;  %v1810_v60 = vpop.f32.mrb[11].mxu0  ;;  %3449 = vmatprep.subr.bf16.mxu0 %v6314_v8  ;;  %v6380_v54 = vld [vmem:[#allocation13 + $0x24] ss:$16 sps:$4 sm:$0xff]  }
 0x229   :  { %v1851_v61 = vpop.f32.mrb[11].mxu1  ;;  %3490 = vmatprep.subr.bf16.mxu1 %v6317_v47  ;;  %v7127_v1 = vadd.f32 %v1848_v52, %v1808_v53  ;;  %v6372_v52 = vld [vmem:[#allocation13] ss:$16 sps:$4 sm:$0xff]   ;;  %v6375_v53 = vld [vmem:[#allocation13 + $0x8] ss:$16 sps:$4 sm:$0xff]  }
 0x22a   :  { %v6383_v55 = vld [vmem:[#allocation13 + $0x2c] ss:$16 sps:$4 sm:$0xff]   ;;  %v6384_v60 = vld [vmem:[#allocation13 + $0x40] ss:$16 sps:$4 sm:$0xff]   ;;  %v6387_v61 = vld [vmem:[#allocation13 + $0x48] ss:$16 sps:$4 sm:$0xff]  }
 0x22b   :  { %3450 = vmatpush1.bf16.msra.mxu0 %v6312_v56  ;;  %v6386_v56 = vld [vmem:[#allocation13 + $0x44] ss:$16 sps:$4 sm:$0xff]  }
 0x22c   :  { %3491 = vmatpush1.bf16.msra.mxu1 %v6315_v57  ;;  %3451 = vmatprep.subr.bf16.mxu0 %v6320_v62  ;;  %v6389_v57 = vld [vmem:[#allocation13 + $0x4c] ss:$16 sps:$4 sm:$0xff]   ;;  %v6392_v62 = vld [vmem:[#allocation13 + $0x64] ss:$16 sps:$4 sm:$0xff]  }
 0x22d   :  { %3492 = vmatprep.subr.bf16.mxu1 %v6323_v63  ;;  %v6395_v63 = vld [vmem:[#allocation13 + $0x6c] ss:$16 sps:$4 sm:$0xff]  }
 0x22f   :  { %3452 = vmatpush1.bf16.msra.mxu0 %v6318_v32  ;;  %v6390_v32 = vld [vmem:[#allocation13 + $0x60] ss:$16 sps:$4 sm:$0xff]  }
 0x230   :  { %3493 = vmatpush1.bf16.msra.mxu1 %v6321_v16  ;;  %3453 = vmatprep.subr.bf16.mxu0 %v6326_v3  ;;  %v6393_v16 = vld [vmem:[#allocation13 + $0x68] ss:$16 sps:$4 sm:$0xff]   ;;  %v6398_v3 = vld [vmem:[#allocation13 + $0x84] ss:$16 sps:$4 sm:$0xff]  }
 0x231   :  { %3494 = vmatprep.subr.bf16.mxu1 %v6329_v4  ;;  %v6401_v4 = vld [vmem:[#allocation13 + $0x8c] ss:$16 sps:$4 sm:$0xff]  }
 0x233   :  { %3454 = vmatpush1.bf16.msra.mxu0 %v6324_v10  ;;  %v6396_v10 = vld [vmem:[#allocation13 + $0x80] ss:$16 sps:$4 sm:$0xff]  }
 0x234   :  { %3495 = vmatpush1.bf16.msra.mxu1 %v6327_v5  ;;  %3455 = vmatprep.subr.bf16.mxu0 %v6332_v6  ;;  %v6399_v5 = vld [vmem:[#allocation13 + $0x88] ss:$16 sps:$4 sm:$0xff]   ;;  %v6404_v6 = vld [vmem:[#allocation13 + $0xa4] ss:$16 sps:$4 sm:$0xff]  }
 0x235   :  { %3496 = vmatprep.subr.bf16.mxu1 %v6335_v7  ;;  %v6407_v7 = vld [vmem:[#allocation13 + $0xac] ss:$16 sps:$4 sm:$0xff]  }
 0x237   :  { %3456 = vmatpush1.bf16.msra.mxu0 %v6330_v9  ;;  %v6402_v9 = vld [vmem:[#allocation13 + $0xa0] ss:$16 sps:$4 sm:$0xff]  }
 0x238   :  { %3497 = vmatpush1.bf16.msra.mxu1 %v6333_v11  ;;  %3457 = vmatprep.subr.bf16.mxu0 %v6338_v14  ;;  %v6405_v11 = vld [vmem:[#allocation13 + $0xa8] ss:$16 sps:$4 sm:$0xff]   ;;  %v6410_v14 = vld [vmem:[#allocation13 + $0xc4] ss:$16 sps:$4 sm:$0xff]  }
 0x239   :  { %3498 = vmatprep.subr.bf16.mxu1 %v6341_v15  ;;  %v6413_v15 = vld [vmem:[#allocation13 + $0xcc] ss:$16 sps:$4 sm:$0xff]  }
 0x23b   :  { %3458 = vmatpush1.bf16.msra.mxu0 %v6336_v18  ;;  %v6408_v18 = vld [vmem:[#allocation13 + $0xc0] ss:$16 sps:$4 sm:$0xff]  }
 0x23c   :  { %3499 = vmatpush1.bf16.msra.mxu1 %v6339_v19  ;;  %3459 = vmatprep.subr.bf16.mxu0 %v6344_v20  ;;  %v6411_v19 = vld [vmem:[#allocation13 + $0xc8] ss:$16 sps:$4 sm:$0xff]   ;;  %v6416_v20 = vld [vmem:[#allocation13 + $0xe4] ss:$16 sps:$4 sm:$0xff]  }
 0x23d   :  { %3500 = vmatprep.subr.bf16.mxu1 %v6347_v21  ;;  %v6419_v21 = vld [vmem:[#allocation13 + $0xec] ss:$16 sps:$4 sm:$0xff]  }
 0x23f   :  { %3460 = vmatpush1.bf16.msra.mxu0 %v6342_v24  ;;  %v6414_v24 = vld [vmem:[#allocation13 + $0xe0] ss:$16 sps:$4 sm:$0xff]  }
 0x240   :  { %3501 = vmatpush1.bf16.msra.mxu1 %v6345_v25  ;;  %3461 = vmatprep.subr.bf16.mxu0 %v6350_v27  ;;  %v6417_v25 = vld [vmem:[#allocation13 + $0xe8] ss:$16 sps:$4 sm:$0xff]   ;;  %v6422_v27 = vld [vmem:[#allocation13 + $0x104] ss:$16 sps:$4 sm:$0xff]  }
 0x241   :  { %3502 = vmatprep.subr.bf16.mxu1 %v6353_v33  ;;  %v6425_v33 = vld [vmem:[#allocation13 + $0x10c] ss:$16 sps:$4 sm:$0xff]  }
 0x243   :  { %3462 = vmatpush1.bf16.msra.mxu0 %v6348_v37  ;;  %v6420_v37 = vld [vmem:[#allocation13 + $0x100] ss:$16 sps:$4 sm:$0xff]  }
 0x244   :  { %3503 = vmatpush1.bf16.msra.mxu1 %v6351_v28  ;;  %3463 = vmatprep.subr.bf16.mxu0 %v6356_v29  ;;  %v6423_v28 = vld [vmem:[#allocation13 + $0x108] ss:$16 sps:$4 sm:$0xff]   ;;  %v6428_v29 = vld [vmem:[#allocation13 + $0x124] ss:$16 sps:$4 sm:$0xff]  }
 0x245   :  { %3504 = vmatprep.subr.bf16.mxu1 %v6359_v30  ;;  %v6431_v30 = vld [vmem:[#allocation13 + $0x12c] ss:$16 sps:$4 sm:$0xff]  }
 0x247   :  { %3464 = vmatpush1.bf16.msra.mxu0 %v6354_v31  ;;  %v6426_v31 = vld [vmem:[#allocation13 + $0x120] ss:$16 sps:$4 sm:$0xff]  }
 0x248   :  { %3505 = vmatpush1.bf16.msra.mxu1 %v6357_v34  ;;  %3465 = vmatprep.subr.bf16.mxu0 %v6362_v35  ;;  %v6429_v34 = vld [vmem:[#allocation13 + $0x128] ss:$16 sps:$4 sm:$0xff]   ;;  %v6822_v35 = vmov 1983009808  }
 0x249   :  { %3506 = vmatprep.subr.bf16.mxu1 %v6365_v12  ;;  %v3549_v12 = vunpack.c.l.s4 %v6822_v35 }
 0x24b   :  { %3466 = vmatpush1.bf16.msra.mxu0 %v6360_v38  ;;  %v3550_v38 = vunpack.c.0.s8 %v3549_v12 }
 0x24c   :  { %3507 = vmatpush1.bf16.msra.mxu1 %v6363_v17  ;;  %3467 = vmatprep.subr.bf16.mxu0 %v6368_v39  ;;  %v7143_v39 = vld [vmem:[%s7229_s6] sm:$0xf] }
 0x24d   :  { %3508 = vmatprep.subr.bf16.mxu1 %v6371_v40  ;;  %v7138_v17 = vsub.s32 %v3550_v38, %v7012_v43  ;;  %v7146_v40 = vsub.s32 0, %v7012_v43 }
 0x24f   :  { %3468 = vmatpush1.bf16.msra.mxu0 %v6366_v0  ;;  %v7148_v0 = vld [vmem:[#allocation7] sm:$0xff] }
 0x250   :  { %3509 = vmatpush1.bf16.msra.mxu1 %v6369_v26  ;;  %v7151_v26 = vsub.s32 1, %v7012_v43 }
 0x252   :  { %3470 = vmatmul.mubr.bf16.vlgmr.msra.gmra.mrb[24].mxu0 %v7099_v58  ;;  %v6374_v58 = vld [vmem:[#allocation13 + $0x4] ss:$16 sps:$4 sm:$0xff]  }
 0x253   :  { %3511 = vmatmul.mubr.bf16.vlgmr.msra.gmra.mrb[24].mxu1 %v7103_v2  ;;  %v6377_v2 = vld [vmem:[#allocation13 + $0xc] ss:$16 sps:$4 sm:$0xff]   ;;  %4458 = vmatprep.subr.bf16.mxu0 %v6374_v58 }
 0x254   :  { %4544 = vmatprep.subr.bf16.mxu1 %v6377_v2  ;;  %4459 = vmatpush1.bf16.msra.mxu0 %v6372_v52 }
 0x255   :  { %4545 = vmatpush1.bf16.msra.mxu1 %v6375_v53  ;;  %4460 = vmatprep.subr.bf16.mxu0 %v6380_v54  ;;  %v3528_v53 = vrot.slane %v7143_v39, %v7151_v26 }
 0x256   :  { %4546 = vmatprep.subr.bf16.mxu1 %v6383_v55  ;;  %v6441_v55 = vld [vmem:[#allocation13 + $0x164] ss:$16 sps:$4 sm:$0xff]  }
 0x265   :  { %v3225_v22 = vpop.f32.mrb[12].mxu0 }
 0x266   :  { %v3266_v45 = vpop.f32.mrb[12].mxu1  ;;  %v3226_v23 = vadd.f32 %v3225_v22, %v7112_v36  ;;  %v3227_v42 = vpop.f32.mrb[13].mxu0  ;;  %v6378_v36 = vld [vmem:[#allocation13 + $0x20] ss:$16 sps:$4 sm:$0xff]   ;;  %v6435_v22 = vld [vmem:[#allocation13 + $0x144] ss:$16 sps:$4 sm:$0xff]  }
 0x267   :  { %v3268_v44 = vpop.f32.mrb[13].mxu1  ;;  %v3228_v46 = vadd.f32 %v3227_v42, %v7117_v41  ;;  %v3229_v8 = vpop.f32.mrb[14].mxu0  ;;  %v6381_v41 = vld [vmem:[#allocation13 + $0x28] ss:$16 sps:$4 sm:$0xff]   ;;  %4461 = vmatpush1.bf16.msra.mxu0 %v6378_v36 }
 0x268   :  { %v3270_v47 = vpop.f32.mrb[14].mxu1  ;;  %v7133_v48 = vadd.f32 %v3266_v45, %v3226_v23  ;;  %v3230_v50 = vpop.f32.mrb[15].mxu0  ;;  %4547 = vmatpush1.bf16.msra.mxu1 %v6381_v41  ;;  %4462 = vmatprep.subr.bf16.mxu0 %v6386_v56  ;;  %v6438_v45 = vld [vmem:[#allocation13 + $0x14c] ss:$16 sps:$4 sm:$0xff]   ;;  %v6433_v23 = vld [vmem:[#allocation13 + $0x140] ss:$16 sps:$4 sm:$0xff]   ;;  %v3554_v8 = vrot.slane %v7148_v0, %v7138_v17 }
 0x269   :  { %v3271_v13 = vpop.f32.mrb[15].mxu1  ;;  %v7135_v51 = vadd.f32 %v3268_v44, %v3228_v46  ;;  %4548 = vmatprep.subr.bf16.mxu1 %v6389_v57  ;;  %v6436_v42 = vld [vmem:[#allocation13 + $0x148] ss:$16 sps:$4 sm:$0xff]   ;;  %v3524_v50 = vrot.slane %v7143_v39, %v7146_v40  ;;  %v6439_v57 = vld [vmem:[#allocation13 + $0x160] ss:$16 sps:$4 sm:$0xff]  }
 0x26b   :  { %4463 = vmatpush1.bf16.msra.mxu0 %v6384_v60 }
 0x26c   :  { %4549 = vmatpush1.bf16.msra.mxu1 %v6387_v61  ;;  %4464 = vmatprep.subr.bf16.mxu0 %v6392_v62  ;;  %v3562_v61 = vcombine.high %v3554_v8, %v3554_v8  ;;  %v6444_v62 = vld [vmem:[#allocation13 + $0x16c] ss:$16 sps:$4 sm:$0xff]  }
 0x26d   :  { %4550 = vmatprep.subr.bf16.mxu1 %v6395_v63 }
 0x26f   :  { %4465 = vmatpush1.bf16.msra.mxu0 %v6390_v32 }
 0x270   :  { %4551 = vmatpush1.bf16.msra.mxu1 %v6393_v16  ;;  %4466 = vmatprep.subr.bf16.mxu0 %v6398_v3  ;;  %v6450_v16 = vld [vmem:[#allocation13 + $0x18c] ss:$16 sps:$4 sm:$0xff]  }
 0x271   :  { %4552 = vmatprep.subr.bf16.mxu1 %v6401_v4  ;;  %v6445_v4 = vld [vmem:[#allocation13 + $0x180] ss:$16 sps:$4 sm:$0xff]  }
 0x273   :  { %4467 = vmatpush1.bf16.msra.mxu0 %v6396_v10  ;;  %v6448_v10 = vld [vmem:[#allocation13 + $0x188] ss:$16 sps:$4 sm:$0xff]  }
 0x274   :  { %4553 = vmatpush1.bf16.msra.mxu1 %v6399_v5  ;;  %4468 = vmatprep.subr.bf16.mxu0 %v6404_v6 }
 0x275   :  { %4554 = vmatprep.subr.bf16.mxu1 %v6407_v7  ;;  %v6453_v7 = vld [vmem:[#allocation13 + $0x1a4] ss:$16 sps:$4 sm:$0xff]  }
 0x277   :  { %4469 = vmatpush1.bf16.msra.mxu0 %v6402_v9  ;;  %v6456_v9 = vld [vmem:[#allocation13 + $0x1ac] ss:$16 sps:$4 sm:$0xff]  }
 0x278   :  { %4555 = vmatpush1.bf16.msra.mxu1 %v6405_v11  ;;  %4470 = vmatprep.subr.bf16.mxu0 %v6410_v14  ;;  %v6451_v11 = vld [vmem:[#allocation13 + $0x1a0] ss:$16 sps:$4 sm:$0xff]   ;;  %v6454_v14 = vld [vmem:[#allocation13 + $0x1a8] ss:$16 sps:$4 sm:$0xff]  }
 0x279   :  { %4556 = vmatprep.subr.bf16.mxu1 %v6413_v15  ;;  %v6459_v15 = vld [vmem:[#allocation13 + $0x1c4] ss:$16 sps:$4 sm:$0xff]  }
 0x27b   :  { %4471 = vmatpush1.bf16.msra.mxu0 %v6408_v18  ;;  %v6462_v18 = vld [vmem:[#allocation13 + $0x1cc] ss:$16 sps:$4 sm:$0xff]  }
 0x27c   :  { %4557 = vmatpush1.bf16.msra.mxu1 %v6411_v19  ;;  %4472 = vmatprep.subr.bf16.mxu0 %v6416_v20  ;;  %v6457_v19 = vld [vmem:[#allocation13 + $0x1c0] ss:$16 sps:$4 sm:$0xff]   ;;  %v6460_v20 = vld [vmem:[#allocation13 + $0x1c8] ss:$16 sps:$4 sm:$0xff]  }
 0x27d   :  { %4558 = vmatprep.subr.bf16.mxu1 %v6419_v21  ;;  %v6465_v21 = vld [vmem:[#allocation13 + $0x1e4] ss:$16 sps:$4 sm:$0xff]  }
 0x27f   :  { %4473 = vmatpush1.bf16.msra.mxu0 %v6414_v24  ;;  %v6463_v24 = vld [vmem:[#allocation13 + $0x1e0] ss:$16 sps:$4 sm:$0xff]  }
 0x280   :  { %4559 = vmatpush1.bf16.msra.mxu1 %v6417_v25  ;;  %4474 = vmatprep.subr.bf16.mxu0 %v6422_v27  ;;  %v6468_v25 = vld [vmem:[#allocation13 + $0x1ec] ss:$16 sps:$4 sm:$0xff]   ;;  %v6466_v27 = vld [vmem:[#allocation13 + $0x1e8] ss:$16 sps:$4 sm:$0xff]  }
 0x281   :  { %4560 = vmatprep.subr.bf16.mxu1 %v6425_v33  ;;  %v6471_v33 = vld [vmem:[#allocation13 + $0x204] ss:$16 sps:$4 sm:$0xff]  }
 0x283   :  { %4475 = vmatpush1.bf16.msra.mxu0 %v6420_v37  ;;  %v6474_v37 = vld [vmem:[#allocation13 + $0x20c] ss:$16 sps:$4 sm:$0xff]  }
 0x284   :  { %4561 = vmatpush1.bf16.msra.mxu1 %v6423_v28  ;;  %4476 = vmatprep.subr.bf16.mxu0 %v6428_v29 }
 0x285   :  { %4562 = vmatprep.subr.bf16.mxu1 %v6431_v30 }
 0x287   :  { %4477 = vmatpush1.bf16.msra.mxu0 %v6426_v31 }
 0x288   :  { %4563 = vmatpush1.bf16.msra.mxu1 %v6429_v34  ;;  %4478 = vmatprep.subr.bf16.mxu0 %v6435_v22 }
 0x289   :  { %4564 = vmatprep.subr.bf16.mxu1 %v6438_v45 }
 0x28b   :  { %4479 = vmatpush1.bf16.msra.mxu0 %v6433_v23 }
 0x28c   :  { %4565 = vmatpush1.bf16.msra.mxu1 %v6436_v42  ;;  %4480 = vmatprep.subr.bf16.mxu0 %v6441_v55 }
 0x28d   :  { %4566 = vmatprep.subr.bf16.mxu1 %v6444_v62 }
 0x28f   :  { %4481 = vmatpush1.bf16.msra.mxu0 %v6439_v57 }
 0x2a5   :  { %v3307_v44 = vpop.f32.mrb[16].mxu0 }
 0x2a6   :  { %v3348_v46 = vpop.f32.mrb[16].mxu1  ;;  %v3308_v47 = vadd.f32 %v3307_v44, %v7133_v48  ;;  %v3309_v13 = vpop.f32.mrb[17].mxu0  ;;  %v6442_v48 = vld [vmem:[#allocation13 + $0x168] ss:$16 sps:$4 sm:$0xff]   ;;  %v3547_v44 = vcombine.high %v7148_v0, %v7148_v0 }
 0x2a7   :  { %v3350_v52 = vpop.f32.mrb[17].mxu1  ;;  %v3310_v58 = vadd.f32 %v3309_v13, %v7135_v51  ;;  %v3311_v2 = vpop.f32.mrb[18].mxu0  ;;  %v6447_v51 = vld [vmem:[#allocation13 + $0x184] ss:$16 sps:$4 sm:$0xff]   ;;  %4567 = vmatpush1.bf16.msra.mxu1 %v6442_v48 }
 0x2a8   :  { %v3352_v54 = vpop.f32.mrb[18].mxu1  ;;  %v3349_v36 = vadd.f32 %v3348_v46, %v3308_v47  ;;  %v3312_v41 = vpop.f32.mrb[19].mxu0  ;;  %4482 = vmatprep.subr.bf16.mxu0 %v6447_v51  ;;  %4568 = vmatprep.subr.bf16.mxu1 %v6450_v16  ;;  %v7172_v46 = vsub.s32 2, %v7012_v43 }
 0x2a9   :  { %v3353_v56 = vpop.f32.mrb[19].mxu1  ;;  %v3351_v60 = vadd.f32 %v3350_v52, %v3310_v58  ;;  %4483 = vmatpush1.bf16.msra.mxu0 %v6445_v4  ;;  %v3649_v4 = vld [vmem:[#allocation8 + $0x8] sm:$0xff] }
 0x2aa   :  { %v3541_v63 = vadd.f32 %v3524_v50, %v3349_v36  ;;  %4484 = vmatprep.subr.bf16.mxu0 %v6453_v7  ;;  %v3561_v50 = vrot.slane %v3547_v44, %v7138_v17  ;;  %v3532_v13 = vrot.slane %v7143_v39, %v7172_v46  ;;  %v3648_v7 = vld [vmem:[#allocation8] sm:$0xff] }
 0x2ab   :  { %v3542_v32 = vadd.f32 %v3528_v53, %v3351_v60  ;;  %4569 = vmatpush1.bf16.msra.mxu1 %v6448_v10  ;;  %v3653_v10 = vld [vmem:[#allocation8 + $0x28] sm:$0xff]  ;;  %v6475_v44 = vld [vmem:[#allocation13 + $0x220] ss:$16 sps:$4 sm:$0xff]  }
 0x2ac   :  { %v7161_v3 = vadd.f32 %v3554_v8, %v3541_v63  ;;  %4570 = vmatprep.subr.bf16.mxu1 %v6456_v9  ;;  %v7175_v8 = vsub.s32 3, %v7012_v43  ;;  %v3563_v56 = vcombine.high %v3561_v50, %v3561_v50  ;;  %v3652_v9 = vld [vmem:[#allocation8 + $0x20] sm:$0xff] }
 0x2ad   :  { %v7163_v5 = vadd.f32 %v3562_v61, %v3542_v32  ;;  %4485 = vmatpush1.bf16.msra.mxu0 %v6451_v11  ;;  %v3651_v11 = vld [vmem:[#allocation8 + $0x18] sm:$0xff] }
 0x2ae   :  { %4486 = vmatprep.subr.bf16.mxu0 %v6459_v15  ;;  %v3536_v0 = vrot.slane %v7143_v39, %v7175_v8 }
 0x2af   :  { %v3576_v6 = vcombine.low %v7161_v3, %v7163_v5  ;;  %4571 = vmatpush1.bf16.msra.mxu1 %v6454_v14 }
 0x2b0   :  { %4572 = vmatprep.subr.bf16.mxu1 %v6462_v18  ;;  %v3650_v18 = vld [vmem:[#allocation8 + $0x10] sm:$0xff] }
 0x2b1   :  { %4487 = vmatpush1.bf16.msra.mxu0 %v6457_v19  ;;  %v3584_v62 = vrot.slane %v3576_v6, %v7015_v49  ;;  %v3655_v6 = vld [vmem:[#allocation8 + $0x38] sm:$0xff]  ;;  %v3654_v19 = vld [vmem:[#allocation8 + $0x30] sm:$0xff] }
 0x2b2   :  { %4488 = vmatprep.subr.bf16.mxu0 %v6465_v21 }
 0x2b3   :  { %4573 = vmatpush1.bf16.msra.mxu1 %v6460_v20 }
 0x2b4   :  { %4574 = vmatprep.subr.bf16.mxu1 %v6468_v25 }
 0x2b5   :  { %4489 = vmatpush1.bf16.msra.mxu0 %v6463_v24 }
 0x2b6   :  { %4501 = vmatprep.subr.bf16.mxu0 %v6471_v33 }
 0x2b7   :  { %4575 = vmatpush1.bf16.msra.mxu1 %v6466_v27 }
 0x2b8   :  { %4587 = vmatprep.subr.bf16.mxu1 %v6474_v37 }
 0x2e5   :  { %v3389_v28 = vpop.f32.mrb[20].mxu0 }
 0x2e6   :  { %v3430_v29 = vpop.f32.mrb[20].mxu1  ;;  %v3390_v30 = vadd.f32 %v3389_v28, %v7125_v59  ;;  %v3391_v31 = vpop.f32.mrb[21].mxu0 }
 0x2e7   :  { %v3432_v34 = vpop.f32.mrb[21].mxu1  ;;  %v3392_v35 = vadd.f32 %v3391_v31, %v7127_v1  ;;  %v3393_v12 = vpop.f32.mrb[22].mxu0 }
 0x2e8   :  { %v3434_v38 = vpop.f32.mrb[22].mxu1  ;;  %v3431_v22 = vadd.f32 %v3430_v29, %v3390_v30  ;;  %v3394_v45 = vpop.f32.mrb[23].mxu0  ;;  %v6472_v12 = vld [vmem:[#allocation13 + $0x208] ss:$16 sps:$4 sm:$0xff]  }
 0x2e9   :  { %v3435_v23 = vpop.f32.mrb[23].mxu1  ;;  %v3433_v42 = vadd.f32 %v3432_v34, %v3392_v35  ;;  %v6469_v35 = vld [vmem:[#allocation13 + $0x200] ss:$16 sps:$4 sm:$0xff]  }
 0x2ea   :  { %v6477_v23 = vld [vmem:[#allocation13 + $0x224] ss:$16 sps:$4 sm:$0xff]  }
 0x325   :  { %v3471_v59 = vpop.f32.mrb[24].mxu0 }
 0x326   :  { %v3512_v47 = vpop.f32.mrb[24].mxu1  ;;  %v3472_v1 = vadd.f32 %v3471_v59, %v3431_v22  ;;  %v3473_v52 = vpop.f32.mrb[25].mxu0  ;;  %v6478_v59 = vld [vmem:[#allocation13 + $0x228] ss:$16 sps:$4 sm:$0xff]  }
 0x327   :  { %v3514_v58 = vpop.f32.mrb[25].mxu1  ;;  %v3474_v53 = vadd.f32 %v3473_v52, %v3433_v42  ;;  %v3475_v2 = vpop.f32.mrb[26].mxu0  ;;  %v6480_v42 = vld [vmem:[#allocation13 + $0x22c] ss:$16 sps:$4 sm:$0xff]   ;;  %v6489_v52 = vld [vmem:[#allocation13 + $0x264] ss:$16 sps:$4 sm:$0xff]  }
 0x328   :  { %v3516_v54 = vpop.f32.mrb[26].mxu1  ;;  %v3513_v55 = vadd.f32 %v3512_v47, %v3472_v1  ;;  %v3476_v36 = vpop.f32.mrb[27].mxu0  ;;  %v6483_v47 = vld [vmem:[#allocation13 + $0x244] ss:$16 sps:$4 sm:$0xff]   ;;  %v6481_v1 = vld [vmem:[#allocation13 + $0x240] ss:$16 sps:$4 sm:$0xff]  }
 0x329   :  { %v3517_v43 = vpop.f32.mrb[27].mxu1  ;;  %v3515_v41 = vadd.f32 %v3514_v58, %v3474_v53  ;;  %v6492_v58 = vld [vmem:[#allocation13 + $0x26c] ss:$16 sps:$4 sm:$0xff]   ;;  %v6487_v53 = vld [vmem:[#allocation13 + $0x260] ss:$16 sps:$4 sm:$0xff]  }
 0x32a   :  { %v3543_v57 = vadd.f32 %v3532_v13, %v3513_v55  ;;  %v6484_v13 = vld [vmem:[#allocation13 + $0x248] ss:$16 sps:$4 sm:$0xff]   ;;  %v6495_v2 = vld [vmem:[#allocation13 + $0x284] ss:$16 sps:$4 sm:$0xff]   ;;  %v6498_v54 = vld [vmem:[#allocation13 + $0x28c] ss:$16 sps:$4 sm:$0xff]  }
 0x32b   :  { %v3544_v48 = vadd.f32 %v3536_v0, %v3515_v41  ;;  %v6490_v0 = vld [vmem:[#allocation13 + $0x268] ss:$16 sps:$4 sm:$0xff]   ;;  %v6493_v55 = vld [vmem:[#allocation13 + $0x280] ss:$16 sps:$4 sm:$0xff]   ;;  %v6501_v43 = vld [vmem:[#allocation13 + $0x2a4] ss:$16 sps:$4 sm:$0xff]  }
 0x32c   :  { %v3570_v17 = vadd.f32 %v3561_v50, %v3543_v57  ;;  %v6486_v50 = vld [vmem:[#allocation13 + $0x24c] ss:$16 sps:$4 sm:$0xff]   ;;  %v6496_v36 = vld [vmem:[#allocation13 + $0x288] ss:$16 sps:$4 sm:$0xff]  }
 0x32d   :  { %v3571_v60 = vadd.f32 %v3563_v56, %v3544_v48  ;;  %v6504_v41 = vld [vmem:[#allocation13 + $0x2ac] ss:$16 sps:$4 sm:$0xff]   ;;  %v6499_v56 = vld [vmem:[#allocation13 + $0x2a0] ss:$16 sps:$4 sm:$0xff]   ;;  %v6502_v57 = vld [vmem:[#allocation13 + $0x2a8] ss:$16 sps:$4 sm:$0xff]  }
 0x32e   :  { %v6507_v48 = vld [vmem:[#allocation13 + $0x2c4] ss:$16 sps:$4 sm:$0xff]  }
 0x32f   :  { %v3577_v61 = vcombine.low %v3570_v17, %v3571_v60  ;;  %v6510_v17 = vld [vmem:[#allocation13 + $0x2cc] ss:$16 sps:$4 sm:$0xff]   ;;  %v6505_v60 = vld [vmem:[#allocation13 + $0x2c0] ss:$16 sps:$4 sm:$0xff]  }
 0x331   :  { %v3591_v63 = vrot.slane %v3577_v61, %v7015_v49  ;;  %v6508_v61 = vld [vmem:[#allocation13 + $0x2c8] ss:$16 sps:$4 sm:$0xff]  }
 0x333   :  { %v3592_v39 = vcombine.low %v3584_v62, %v3591_v63  ;;  %v3593_v32 = vcombine.high %v3584_v62, %v3591_v63  ;;  %v6513_v62 = vld [vmem:[#allocation13 + $0x2e4] ss:$16 sps:$4 sm:$0xff]   ;;  %v6516_v63 = vld [vmem:[#allocation13 + $0x2ec] ss:$16 sps:$4 sm:$0xff]  }
 0x335   :  { %v3600_v51 = vrot.slane %v3592_v39, %v7015_v49  ;;  %v3607_v16 = vrot.slane %v3593_v32, %v7015_v49  ;;  %v6511_v39 = vld [vmem:[#allocation13 + $0x2e0] ss:$16 sps:$4 sm:$0xff]   ;;  %v6514_v32 = vld [vmem:[#allocation13 + $0x2e8] ss:$16 sps:$4 sm:$0xff]  }
 0x337   :  { %v3615_v14 = vrot.slane %v3600_v51, %v7151_v26  ;;  %v3631_v15 = vrot.slane %v3607_v16, %v7151_v26  ;;  %v3611_v3 = vrot.slane %v3600_v51, %v7146_v40  ;;  %v3627_v5 = vrot.slane %v3607_v16, %v7146_v40 }
 0x338   :  { %v3623_v20 = vrot.slane %v3600_v51, %v7175_v8  ;;  %v3639_v49 = vrot.slane %v3607_v16, %v7175_v8  ;;  %v3619_v21 = vrot.slane %v3600_v51, %v7172_v46  ;;  %v3635_v24 = vrot.slane %v3607_v16, %v7172_v46  ;;  %v6519_v51 = vld [vmem:[#allocation13 + $0x304] ss:$16 sps:$4 sm:$0xff]   ;;  %v6522_v16 = vld [vmem:[#allocation13 + $0x30c] ss:$16 sps:$4 sm:$0xff]  }
 0x339   :  { %v3657_v25 = vadd.f32 %v3649_v4, %v3615_v14  ;;  %v3661_v27 = vadd.f32 %v3653_v10, %v3631_v15  ;;  %v3656_v33 = vadd.f32 %v3648_v7, %v3611_v3  ;;  %v3660_v37 = vadd.f32 %v3652_v9, %v3627_v5  ;;  %v6517_v4 = vld [vmem:[#allocation13 + $0x300] ss:$16 sps:$4 sm:$0xff]   ;;  %v6520_v10 = vld [vmem:[#allocation13 + $0x308] ss:$16 sps:$4 sm:$0xff]   ;;  %v6525_v7 = vld [vmem:[#allocation13 + $0x324] ss:$16 sps:$4 sm:$0xff]  }
 0x33a   :  { %v3659_v28 = vadd.f32 %v3651_v11, %v3623_v20  ;;  %v3663_v29 = vadd.f32 %v3655_v6, %v3639_v49  ;;  %v3658_v30 = vadd.f32 %v3650_v18, %v3619_v21  ;;  %v3662_v31 = vadd.f32 %v3654_v19, %v3635_v24  ;;  %v6528_v9 = vld [vmem:[#allocation13 + $0x32c] ss:$16 sps:$4 sm:$0xff]   ;;  %v6523_v11 = vld [vmem:[#allocation13 + $0x320] ss:$16 sps:$4 sm:$0xff]   ;;  %v6526_v14 = vld [vmem:[#allocation13 + $0x328] ss:$16 sps:$4 sm:$0xff]  }
 0x33b   :  { %v3665_v34 = vpack.c.bf16 %v3661_v27, %v3657_v25  ;;  %v3664_v38 = vpack.c.bf16 %v3660_v37, %v3656_v33  ;;  %v6531_v15 = vld [vmem:[#allocation13 + $0x344] ss:$16 sps:$4 sm:$0xff]   ;;  %v6534_v3 = vld [vmem:[#allocation13 + $0x34c] ss:$16 sps:$4 sm:$0xff]   ;;  %v6529_v5 = vld [vmem:[#allocation13 + $0x340] ss:$16 sps:$4 sm:$0xff]  }
 0x33c   :  { %v3667_v22 = vpack.c.bf16 %v3663_v29, %v3659_v28  ;;  %v7197_v45 = vpack.c.bf16 %v3662_v31, %v3658_v30  ;;  %v6532_v6 = vld [vmem:[#allocation13 + $0x348] ss:$16 sps:$4 sm:$0xff]   ;;  %v6537_v18 = vld [vmem:[#allocation13 + $0x364] ss:$16 sps:$4 sm:$0xff]   ;;  %v6540_v19 = vld [vmem:[#allocation13 + $0x36c] ss:$16 sps:$4 sm:$0xff]  }
 0x33d   :  { %4490 = vmatprep.mubr.bf16.mxu0 %v3665_v34  ;;  %4576 = vmatprep.mubr.bf16.mxu1 %v3665_v34  ;;  %v6535_v20 = vld [vmem:[#allocation13 + $0x360] ss:$16 sps:$4 sm:$0xff]   ;;  %v6538_v49 = vld [vmem:[#allocation13 + $0x368] ss:$16 sps:$4 sm:$0xff]   ;;  %v6543_v21 = vld [vmem:[#allocation13 + $0x384] ss:$16 sps:$4 sm:$0xff]  }
 0x33e   :  { %4491 = vmatmul.mubr.bf16.vlgmr.msra.gmra.mrb[28].mxu0 %v3664_v38  ;;  %4577 = vmatmul.mubr.bf16.vlgmr.msra.gmra.mrb[28].mxu1 %v3664_v38  ;;  %v6546_v24 = vld [vmem:[#allocation13 + $0x38c] ss:$16 sps:$4 sm:$0xff]   ;;  %v6541_v25 = vld [vmem:[#allocation13 + $0x380] ss:$16 sps:$4 sm:$0xff]   ;;  %v6544_v27 = vld [vmem:[#allocation13 + $0x388] ss:$16 sps:$4 sm:$0xff]  }
 0x33f   :  { %4502 = vmatpush1.bf16.msra.mxu0 %v6469_v35  ;;  %4588 = vmatpush1.bf16.msra.mxu1 %v6472_v12  ;;  %v6549_v33 = vld [vmem:[#allocation13 + $0x3a4] ss:$16 sps:$4 sm:$0xff]   ;;  %v6552_v37 = vld [vmem:[#allocation13 + $0x3ac] ss:$16 sps:$4 sm:$0xff]   ;;  %v6547_v28 = vld [vmem:[#allocation13 + $0x3a0] ss:$16 sps:$4 sm:$0xff]  }
 0x340   :  { %4533 = vmatprep.mubr.bf16.mxu0 %v3667_v22  ;;  %4619 = vmatprep.mubr.bf16.mxu1 %v3667_v22  ;;  %v6550_v29 = vld [vmem:[#allocation13 + $0x3a8] ss:$16 sps:$4 sm:$0xff]   ;;  %v6555_v30 = vld [vmem:[#allocation13 + $0x3c4] ss:$16 sps:$4 sm:$0xff]   ;;  %v6558_v31 = vld [vmem:[#allocation13 + $0x3cc] ss:$16 sps:$4 sm:$0xff]  }
 0x341   :  { %4503 = vmatprep.subr.bf16.mxu0 %v6477_v23  ;;  %4589 = vmatprep.subr.bf16.mxu1 %v6480_v42  ;;  %v6553_v34 = vld [vmem:[#allocation13 + $0x3c0] ss:$16 sps:$4 sm:$0xff]   ;;  %v6556_v35 = vld [vmem:[#allocation13 + $0x3c8] ss:$16 sps:$4 sm:$0xff]   ;;  %v6561_v12 = vld [vmem:[#allocation13 + $0x3e4] ss:$16 sps:$4 sm:$0xff]  }
 0x342   :  { %v6564_v38 = vld [vmem:[#allocation13 + $0x3ec] ss:$16 sps:$4 sm:$0xff]   ;;  %v6559_v22 = vld [vmem:[#allocation13 + $0x3e0] ss:$16 sps:$4 sm:$0xff]   ;;  %v6562_v23 = vld [vmem:[#allocation13 + $0x3e8] ss:$16 sps:$4 sm:$0xff]  }
 0x343   :  { %4504 = vmatpush1.bf16.msra.mxu0 %v6475_v44  ;;  %4590 = vmatpush1.bf16.msra.mxu1 %v6478_v59  ;;  %v6565_v42 = vld [vmem:[#allocation14 + $0x40] sm:$0xff]  }
 0x344   :  { %4505 = vmatprep.subr.bf16.mxu0 %v6483_v47  ;;  %4591 = vmatprep.subr.bf16.mxu1 %v6486_v50  ;;  %v6566_v44 = vld [vmem:[#allocation14 + $0xc0] sm:$0xff]   ;;  %v6569_v50 = vld [vmem:[#allocation14 + $0x48] sm:$0xff]  }
 0x345   :  { %v6567_v59 = vld [vmem:[#allocation14] sm:$0xff]  }
 0x346   :  { %v6568_v47 = vld [vmem:[#allocation14 + $0x80] sm:$0xff]  }
 0x347   :  { %4506 = vmatpush1.bf16.msra.mxu0 %v6481_v1  ;;  %4592 = vmatpush1.bf16.msra.mxu1 %v6484_v13  ;;  %v6570_v1 = vld [vmem:[#allocation14 + $0xc8] sm:$0xff]  }
 0x348   :  { %4507 = vmatprep.subr.bf16.mxu0 %v6489_v52  ;;  %4593 = vmatprep.subr.bf16.mxu1 %v6492_v58  ;;  %v6571_v13 = vld [vmem:[#allocation14 + $0x8] sm:$0xff]   ;;  %v6573_v58 = vld [vmem:[#allocation14 + $0x50] sm:$0xff]  }
 0x349   :  { %v6572_v52 = vld [vmem:[#allocation14 + $0x88] sm:$0xff]  }
 0x34b   :  { %4508 = vmatpush1.bf16.msra.mxu0 %v6487_v53  ;;  %4594 = vmatpush1.bf16.msra.mxu1 %v6490_v0  ;;  %v6574_v53 = vld [vmem:[#allocation14 + $0xd0] sm:$0xff]  }
 0x34c   :  { %4509 = vmatprep.subr.bf16.mxu0 %v6495_v2  ;;  %4595 = vmatprep.subr.bf16.mxu1 %v6498_v54  ;;  %v6575_v0 = vld [vmem:[#allocation14 + $0x10] sm:$0xff]   ;;  %v6577_v54 = vld [vmem:[#allocation14 + $0x58] sm:$0xff]  }
 0x34d   :  { %v6576_v2 = vld [vmem:[#allocation14 + $0x90] sm:$0xff]  }
 0x34f   :  { %4510 = vmatpush1.bf16.msra.mxu0 %v6493_v55  ;;  %4596 = vmatpush1.bf16.msra.mxu1 %v6496_v36  ;;  %v6578_v55 = vld [vmem:[#allocation14 + $0xd8] sm:$0xff]  }
 0x350   :  { %4511 = vmatprep.subr.bf16.mxu0 %v6501_v43  ;;  %4597 = vmatprep.subr.bf16.mxu1 %v6504_v41  ;;  %v6579_v36 = vld [vmem:[#allocation14 + $0x18] sm:$0xff]   ;;  %v6581_v43 = vld [vmem:[#allocation14 + $0x60] sm:$0xff]  }
 0x351   :  { %v6582_v41 = vld [vmem:[#allocation14 + $0xe0] sm:$0xff]  }
 0x353   :  { %4512 = vmatpush1.bf16.msra.mxu0 %v6499_v56  ;;  %4598 = vmatpush1.bf16.msra.mxu1 %v6502_v57  ;;  %v6583_v56 = vld [vmem:[#allocation14 + $0x20] sm:$0xff]  }
 0x354   :  { %4513 = vmatprep.subr.bf16.mxu0 %v6507_v48  ;;  %4599 = vmatprep.subr.bf16.mxu1 %v6510_v17  ;;  %v6584_v57 = vld [vmem:[#allocation14 + $0xa0] sm:$0xff]   ;;  %v6585_v48 = vld [vmem:[#allocation14 + $0x68] sm:$0xff]  }
 0x355   :  { %v6586_v17 = vld [vmem:[#allocation14 + $0xe8] sm:$0xff]  }
 0x357   :  { %4514 = vmatpush1.bf16.msra.mxu0 %v6505_v60  ;;  %4600 = vmatpush1.bf16.msra.mxu1 %v6508_v61  ;;  %v6587_v60 = vld [vmem:[#allocation14 + $0x28] sm:$0xff]  }
 0x358   :  { %4515 = vmatprep.subr.bf16.mxu0 %v6513_v62  ;;  %4601 = vmatprep.subr.bf16.mxu1 %v6516_v63  ;;  %v6588_v61 = vld [vmem:[#allocation14 + $0xa8] sm:$0xff]   ;;  %v6589_v62 = vld [vmem:[#allocation14 + $0x70] sm:$0xff]  }
 0x359   :  { %v6590_v63 = vld [vmem:[#allocation14 + $0xf0] sm:$0xff]  }
 0x35b   :  { %4516 = vmatpush1.bf16.msra.mxu0 %v6511_v39  ;;  %4602 = vmatpush1.bf16.msra.mxu1 %v6514_v32  ;;  %v6591_v39 = vld [vmem:[#allocation14 + $0x30] sm:$0xff]  }
 0x35c   :  { %4517 = vmatprep.subr.bf16.mxu0 %v6519_v51  ;;  %4603 = vmatprep.subr.bf16.mxu1 %v6522_v16  ;;  %v6592_v32 = vld [vmem:[#allocation14 + $0xb0] sm:$0xff]   ;;  %v6593_v51 = vld [vmem:[#allocation14 + $0x78] sm:$0xff]  }
 0x35d   :  { %v6594_v16 = vld [vmem:[#allocation14 + $0xf8] sm:$0xff]  }
 0x35f   :  { %4518 = vmatpush1.bf16.msra.mxu0 %v6517_v4  ;;  %4604 = vmatpush1.bf16.msra.mxu1 %v6520_v10  ;;  %v6595_v4 = vld [vmem:[#allocation14 + $0x38] sm:$0xff]  }
 0x360   :  { %4519 = vmatprep.subr.bf16.mxu0 %v6525_v7  ;;  %4605 = vmatprep.subr.bf16.mxu1 %v6528_v9  ;;  %v6596_v10 = vld [vmem:[#allocation14 + $0xb8] sm:$0xff]   ;;  %v3796_v7 = vld [vmem:[%s7231_s8] sm:$0xf] }
 0x361   :  { %v3801_v9 = vrot.slane %v3796_v7, %v7146_v40 }
 0x363   :  { %4520 = vmatpush1.bf16.msra.mxu0 %v6523_v11  ;;  %4606 = vmatpush1.bf16.msra.mxu1 %v6526_v14  ;;  %v3809_v11 = vrot.slane %v3796_v7, %v7172_v46  ;;  %v3805_v14 = vrot.slane %v3796_v7, %v7151_v26 }
 0x364   :  { %4521 = vmatprep.subr.bf16.mxu0 %v6531_v15  ;;  %4607 = vmatprep.subr.bf16.mxu1 %v6534_v3  ;;  %v3813_v15 = vrot.slane %v3796_v7, %v7175_v8 }
 0x367   :  { %4522 = vmatpush1.bf16.msra.mxu0 %v6529_v5  ;;  %4608 = vmatpush1.bf16.msra.mxu1 %v6532_v6 }
 0x368   :  { %4523 = vmatprep.subr.bf16.mxu0 %v6537_v18  ;;  %4609 = vmatprep.subr.bf16.mxu1 %v6540_v19 }
 0x36b   :  { %4524 = vmatpush1.bf16.msra.mxu0 %v6535_v20  ;;  %4610 = vmatpush1.bf16.msra.mxu1 %v6538_v49 }
 0x36c   :  { %4525 = vmatprep.subr.bf16.mxu0 %v6543_v21  ;;  %4611 = vmatprep.subr.bf16.mxu1 %v6546_v24 }
 0x36f   :  { %4526 = vmatpush1.bf16.msra.mxu0 %v6541_v25  ;;  %4612 = vmatpush1.bf16.msra.mxu1 %v6544_v27 }
 0x370   :  { %4527 = vmatprep.subr.bf16.mxu0 %v6549_v33  ;;  %4613 = vmatprep.subr.bf16.mxu1 %v6552_v37 }
 0x373   :  { %4528 = vmatpush1.bf16.msra.mxu0 %v6547_v28  ;;  %4614 = vmatpush1.bf16.msra.mxu1 %v6550_v29 }
 0x374   :  { %4529 = vmatprep.subr.bf16.mxu0 %v6555_v30  ;;  %4615 = vmatprep.subr.bf16.mxu1 %v6558_v31 }
 0x377   :  { %4530 = vmatpush1.bf16.msra.mxu0 %v6553_v34  ;;  %4616 = vmatpush1.bf16.msra.mxu1 %v6556_v35 }
 0x378   :  { %4531 = vmatprep.subr.bf16.mxu0 %v6561_v12  ;;  %4617 = vmatprep.subr.bf16.mxu1 %v6564_v38 }
 0x37b   :  { %4532 = vmatpush1.bf16.msra.mxu0 %v6559_v22  ;;  %4618 = vmatpush1.bf16.msra.mxu1 %v6562_v23 }
 0x37c   :  { %5619 = vmatprep.subr.bf16.mxu0 %v6565_v42  ;;  %5641 = vmatprep.subr.bf16.mxu1 %v6566_v44 }
 0x37e   :  { %4534 = vmatmul.mubr.bf16.vlgmr.msra.gmra.mrb[28].mxu0 %v7197_v45  ;;  %4620 = vmatmul.mubr.bf16.vlgmr.msra.gmra.mrb[28].mxu1 %v7197_v45  ;;  %v6580_v45 = vld [vmem:[#allocation14 + $0x98] sm:$0xff]  }
 0x37f   :  { %5620 = vmatpush3.bf16.msra.mxu0 %v6567_v59  ;;  %5642 = vmatpush3.bf16.msra.mxu1 %v6568_v47  ;;  %v5586_v47 = vld [vmem:[%s7233_s10] ss:$0 sm:$0xff]  ;;  %s6773_s10 = scalar_lea.vmem %s4995_s17, 256 }
 0x380   :  { %5621 = vmatprep.subr.bf16.mxu0 %v6569_v50  ;;  %5643 = vmatprep.subr.bf16.mxu1 %v6570_v1  ;;  %p6774_p8 = scmp.ne.s32.totalorder %s4995_s17, %s6773_s10  ;;  %p6779_p10 = scmp.lt.s32.totalorder %s6773_s10, %s6773_s10 }
 0x382   :  { %p6780_p11 = por %p6779_p10, %p6778_p9 }
 0x383   :  { %5622 = vmatpush3.bf16.msra.mxu0 %v6571_v13  ;;  %5644 = vmatpush3.bf16.msra.mxu1 %v6572_v52 }
 0x384   :  { %5623 = vmatprep.subr.bf16.mxu0 %v6573_v58  ;;  %5645 = vmatprep.subr.bf16.mxu1 %v6574_v53  ;;  %p6781_p12 = pnand %p6780_p11, %p6774_p8 }
 0x387   :  { %5624 = vmatpush3.bf16.msra.mxu0 %v6575_v0  ;;  %5646 = vmatpush3.bf16.msra.mxu1 %v6576_v2 }
 0x388   :  { %5625 = vmatprep.subr.bf16.mxu0 %v6577_v54  ;;  %5647 = vmatprep.subr.bf16.mxu1 %v6578_v55 }
 0x38b   :  { %5626 = vmatpush3.bf16.msra.mxu0 %v6579_v36  ;;  %5648 = vmatpush3.bf16.msra.mxu1 %v6580_v45 }
 0x38c   :  { %5627 = vmatprep.subr.bf16.mxu0 %v6581_v43  ;;  %5649 = vmatprep.subr.bf16.mxu1 %v6582_v41 }
 0x38f   :  { %5628 = vmatpush3.bf16.msra.mxu0 %v6583_v56  ;;  %5650 = vmatpush3.bf16.msra.mxu1 %v6584_v57 }
 0x390   :  { %5629 = vmatprep.subr.bf16.mxu0 %v6585_v48  ;;  %5651 = vmatprep.subr.bf16.mxu1 %v6586_v17 }
 0x393   :  { %5630 = vmatpush3.bf16.msra.mxu0 %v6587_v60  ;;  %5652 = vmatpush3.bf16.msra.mxu1 %v6588_v61 }
 0x394   :  { %5631 = vmatprep.subr.bf16.mxu0 %v6589_v62  ;;  %5653 = vmatprep.subr.bf16.mxu1 %v6590_v63 }
 0x397   :  { %5632 = vmatpush3.bf16.msra.mxu0 %v6591_v39  ;;  %5654 = vmatpush3.bf16.msra.mxu1 %v6592_v32 }
 0x398   :  { %5633 = vmatprep.subr.bf16.mxu0 %v6593_v51  ;;  %5655 = vmatprep.subr.bf16.mxu1 %v6594_v16 }
 0x39b   :  { %5634 = vmatpush3.bf16.msra.mxu0 %v6595_v4  ;;  %5656 = vmatpush3.bf16.msra.mxu1 %v6596_v10 }
 0x451   :  { %v4535_v3 = vpop.f32.mrb[28].mxu0  ;;  %v4621_v5 = vpop.f32.mrb[28].mxu1 }
 0x452   :  { %v5663_v6 = vadd.f32 %v4535_v3, %v3801_v9  ;;  %v5667_v18 = vadd.f32 %v4621_v5, %v3809_v11  ;;  %v4537_v19 = vpop.f32.mrb[29].mxu0  ;;  %v4623_v20 = vpop.f32.mrb[29].mxu1 }
 0x453   :  { %v5664_v49 = vadd.f32 %v4537_v19, %v3805_v14  ;;  %v5668_v21 = vadd.f32 %v4623_v20, %v3813_v15  ;;  %v4539_v24 = vpop.f32.mrb[30].mxu0  ;;  %v4625_v25 = vpop.f32.mrb[30].mxu1 }
 0x454   :  { %v5665_v27 = vadd.f32 %v4539_v24, %v3801_v9  ;;  %v5669_v33 = vadd.f32 %v4625_v25, %v3809_v11  ;;  %v4541_v37 = vpop.f32.mrb[31].mxu0  ;;  %v4627_v40 = vpop.f32.mrb[31].mxu1  ;;  %v4630_v29 = vmax.f32 %v5663_v6, 0.0  ;;  %v4632_v26 = vmax.f32 %v5667_v18, 0.0 }
 0x455   :  { %v5666_v28 = vadd.f32 %v4541_v37, %v3805_v14  ;;  %v5670_v46 = vadd.f32 %v4627_v40, %v3813_v15  ;;  %v4631_v31 = vmax.f32 %v5664_v49, 0.0  ;;  %v4633_v34 = vmax.f32 %v5668_v21, 0.0 }
 0x456   :  { %v4634_v30 = vmax.f32 %v5665_v27, 0.0  ;;  %v4636_v8 = vmax.f32 %v5669_v33, 0.0 }
 0x457   :  { %v4635_v35 = vmax.f32 %v5666_v28, 0.0  ;;  %v4637_v12 = vmax.f32 %v5670_v46, 0.0 }
 0x458   :  { %v4638_v38 = vpack.c.bf16 %v4634_v30, %v4630_v29  ;;  %v4640_v22 = vpack.c.bf16 %v4636_v8, %v4632_v26 }
 0x459   :  { %v4639_v23 = vpack.c.bf16 %v4635_v35, %v4631_v31  ;;  %v4641_v42 = vpack.c.bf16 %v4637_v12, %v4633_v34 }
 0x45b   :  { %4937 = vmatprep.mubr.bf16.mxu0 %v4639_v23  ;;  %4978 = vmatprep.mubr.bf16.mxu1 %v4641_v42 }
 0x45c   :  { %4938 = vmatmul.mubr.bf16.vlgmr.msra.gmra.mrb[32].mxu0 %v4638_v38  ;;  %4979 = vmatmul.mubr.bf16.vlgmr.msra.gmra.mrb[32].mxu1 %v4640_v22 }
 0x52f   :  { %v5635_v44 = vpop.f32.mrb[32].mxu0  ;;  %v5657_v59 = vpop.f32.mrb[32].mxu1 }
 0x530   :  { %v5636_v50 = vpop.f32.mrb[33].mxu0  ;;  %v5658_v1 = vpop.f32.mrb[33].mxu1 }
 0x531   :  { %v5637_v13 = vadd.f32 %v5636_v50, %v5635_v44  ;;  %v5659_v52 = vadd.f32 %v5658_v1, %v5657_v59  ;;  %v5638_v58 = vpop.f32.mrb[34].mxu0  ;;  %v5660_v53 = vpop.f32.mrb[34].mxu1 }
 0x532   :  { %v5639_v0 = vpop.f32.mrb[35].mxu0  ;;  %v5661_v2 = vpop.f32.mrb[35].mxu1 }
 0x533   :  { %v4940_v54 = vadd.f32 %v5637_v13, %v5586_v47  ;;  %v5640_v55 = vadd.f32 %v5639_v0, %v5638_v58  ;;  %v5662_v36 = vadd.f32 %v5661_v2, %v5660_v53 }
 0x535   :  { %v4981_v45 = vadd.f32 %v5659_v52, %v4940_v54  ;;  %v4943_v43 = vadd.f32 %v5640_v55, %v5586_v47 }
 0x537   :  { %4987 = vst [vmem:[#allocation16] sm:$0xff] %v4981_v45  ;;  %v4984_v41 = vadd.f32 %v5662_v36, %v4943_v43 }
 0x539   :  { %4988 = vst [vmem:[#allocation16 + $0x8] sm:$0xff] %v4984_v41 }
 0x53a   :  { %6784 = shalt.err (!%p6781_p12)
}
 0x53b   :  { %s6785_s1 = scalar_lea.hbm %s7234_s11, 256 }
 0x53c   :  { %p6786_p13 = scmp.ne.s32.totalorder %s7234_s11, %s6785_s1  ;;  %p6789_p0 = scmp.lt.u32.totalorder %s6785_s1, %s7234_s11 }
 0x53e   :  { %p6791_p1 = pnand %p6789_p0, %p6786_p13 }
 0x540   :  { %6794 = shalt.err (!%p6791_p1)
}
 0x541   :  { %s6824_s13 = smov 128   ;;  %s6825_s22 = smov 8  }
 0x542   :  { %5000 = dma.vmem_to_hbm [thread:$0]  %s4995_s17, 256, %s7234_s11, [#allocation4], %s6824_s13, %s6824_s13, %s6825_s22  }
 0x543   :  { %6805 = dma.done.wait [#allocation4], 256  }
 0x544   :  { %6806 = vsyncadd [#allocation4], 4294967040 }
 0x545   :  { %5004 = vsyncpa [#allocation3], 1 }
 0x546   :  { %5005 = vsyncpa [#allocation6], 1 }
 0x547   :  { %5006 = vsyncpa [#allocation9], 1 }
 0x548   :  { %5007 = vsyncpa [#allocation12], 1 }
 0x549   :  { %5008 = vsyncpa [#allocation15], 1 }
 0x54a   :  { %5009 = vsyncpa [#allocation4], 1 }

</bundles_post_ra>
